<compile_context>
chip_gen: v5e
topology: v5e:2x2
jax: 0.10.0
libtpu: 0.0.40
codegen_flags: <defaults>
</compile_context>

<pallas_src>
import functools

import jax
import jax.numpy as jnp
from jax.experimental import pallas as pl
from jax.experimental.pallas import tpu as pltpu


def _round_up(n, m):
    return ((n + m - 1) // m) * m


def _pad2d(a, rows, cols):
    return jnp.pad(a, ((0, rows - a.shape[0]), (0, cols - a.shape[1])))


def _choose_tiles(n_p):
    """Row tile tm (prefer >=2 row blocks so v7x megacore shards the parallel
    axis) and reduction tile tk.  n_p is a multiple of 256, so the tiles always
    divide -- never the full-extent fallback."""
    if n_p % 512 == 0 and n_p // 512 >= 2:
        tm = 512
    elif n_p // 256 >= 2:
        tm = 256
    else:
        tm = 128
    tk = 512 if n_p % 512 == 0 else 256
    return tm, tk


def _vmem_limit(need_bytes):
    # Actual double-buffered need + headroom for Mosaic internal scratch.
    # No 32 MiB floor; capped below v7x's 64 MiB physical VMEM.
    return int(min(max(need_bytes + (8 << 20), 16 << 20), 56 << 20))


_RESIDENT_H_BYTES = 16 << 20  # keep h fully VMEM-resident below this size


# --------------------------------------------------------------------------- #
# Kernel 1: one propagation hop  y = adj @ h  (row-tiled, k-accumulated)
# --------------------------------------------------------------------------- #
def _propagate_kernel(adj_ref, h_ref, out_ref, acc_ref, *, bf16, resident_h, tk):
    k = pl.program_id(1)

    @pl.when(k == 0)
    def _():
        acc_ref[...] = jnp.zeros_like(acc_ref)

    a = adj_ref[...]
    if resident_h:
        # h is fully VMEM-resident (constant block index): slice the k-slab.
        h = h_ref[pl.ds(pl.multiple_of(k * tk, tk), tk), :]
    else:
        h = h_ref[...]
    if bf16:
        a = a.astype(jnp.bfloat16)
        h = h.astype(jnp.bfloat16)
    acc_ref[...] += jnp.dot(a, h, preferred_element_type=jnp.float32)

    @pl.when(k == pl.num_programs(1) - 1)
    def _():
        out_ref[...] = acc_ref[...].astype(out_ref.dtype)


def _propagate(adj, h, *, bf16):
    n_p = adj.shape[0]
    f_p = h.shape[1]
    tm, tk = _choose_tiles(n_p)
    adj_item = jnp.dtype(adj.dtype).itemsize
    h_item = jnp.dtype(h.dtype).itemsize
    out_dtype = jnp.bfloat16 if bf16 else jnp.float32
    out_item = jnp.dtype(out_dtype).itemsize

    resident_h = n_p * f_p * h_item <= _RESIDENT_H_BYTES
    if resident_h:
        h_spec = pl.BlockSpec((n_p, f_p), lambda i, k: (0, 0))
        h_vmem = 2 * n_p * f_p * h_item
        h_hbm = n_p * f_p * h_item
    else:
        h_spec = pl.BlockSpec((tk, f_p), lambda i, k: (k, 0))
        h_vmem = 2 * tk * f_p * h_item
        h_hbm = (n_p // tm) * n_p * f_p * h_item

    need = (2 * tm * tk * adj_item + h_vmem
            + 2 * tm * f_p * out_item + tm * f_p * 4)

    return pl.pallas_call(
        functools.partial(_propagate_kernel, bf16=bf16,
                          resident_h=resident_h, tk=tk),
        out_shape=jax.ShapeDtypeStruct((n_p, f_p), out_dtype),
        grid_spec=pltpu.PrefetchScalarGridSpec(
            num_scalar_prefetch=0,
            grid=(n_p // tm, n_p // tk),
            in_specs=[
                pl.BlockSpec((tm, tk), lambda i, k: (i, k)),   # adj row/col tile
                h_spec,                                        # features
            ],
            out_specs=pl.BlockSpec((tm, f_p), lambda i, k: (i, 0)),
            scratch_shapes=[pltpu.VMEM((tm, f_p), jnp.float32)],
        ),
        compiler_params=pltpu.CompilerParams(
            dimension_semantics=("parallel", "arbitrary"),
            vmem_limit_bytes=_vmem_limit(need),
        ),
        cost_estimate=pl.CostEstimate(
            flops=2 * n_p * n_p * f_p,
            transcendentals=0,
            bytes_accessed=(n_p * n_p * adj_item + h_hbm
                            + n_p * f_p * out_item),
        ),
    )(adj, h)


# --------------------------------------------------------------------------- #
# Kernel 2: final hop (adj @ p2) FUSED with the head:
#   per-branch linear + ReLU, single stacked-K fc matmul, bias, sigmoid.
# --------------------------------------------------------------------------- #
def _final_hop_head_kernel(adj_ref, h_ref, p1_ref, p2_ref,
                           w1_ref, b1_ref, w2_ref, b2_ref, w3_ref, b3_ref,
                           wf_ref, bfc_ref, out_ref, acc_ref,
                           *, bf16, resident_h, tk):
    k = pl.program_id(1)

    @pl.when(k == 0)
    def _():
        acc_ref[...] = jnp.zeros_like(acc_ref)

    a = adj_ref[...]
    if resident_h:
        h = h_ref[pl.ds(pl.multiple_of(k * tk, tk), tk), :]
    else:
        h = h_ref[...]
    if bf16:
        a = a.astype(jnp.bfloat16)
        h = h.astype(jnp.bfloat16)
    acc_ref[...] += jnp.dot(a, h, preferred_element_type=jnp.float32)

    @pl.when(k == pl.num_programs(1) - 1)
    def _():
        cdt = jnp.bfloat16 if bf16 else jnp.float32
        p3 = acc_ref[...].astype(cdt)

        def branch(p, w_ref, b_ref):
            z = jnp.dot(p, w_ref[...],
                        preferred_element_type=jnp.float32) + b_ref[...]
            # ReLU(concat(h1,h2,h3)) == concat(ReLU(h1), ReLU(h2), ReLU(h3))
            return jnp.maximum(z, 0.0)

        h1 = branch(p1_ref[...], w1_ref, b1_ref)
        h2 = branch(p2_ref[...], w2_ref, b2_ref)
        h3 = branch(p3, w3_ref, b3_ref)

        # TODO(synk): training-mode dropout omitted (eval semantics => identity).

        # Single K = 3*hp MXU op against the host-side stacked fc weight.
        hc = jnp.concatenate([h1, h2, h3], axis=1).astype(cdt)
        logits = jnp.dot(hc, wf_ref[...],
                         preferred_element_type=jnp.float32) + bfc_ref[...]
        out_ref[...] = jax.nn.sigmoid(logits)


def _final_hop_head(adj, p1, p2, w, b, wf, bfc, *, bf16):
    n_p = adj.shape[0]
    f_p = p1.shape[1]
    hp = w[0].shape[1]
    lp = wf.shape[1]
    tm, tk = _choose_tiles(n_p)
    adj_item = jnp.dtype(adj.dtype).itemsize
    h_item = jnp.dtype(p2.dtype).itemsize

    resident_h = n_p * f_p * h_item <= _RESIDENT_H_BYTES
    if resident_h:
        h_spec = pl.BlockSpec((n_p, f_p), lambda i, k: (0, 0))
        h_vmem = 2 * n_p * f_p * h_item
    else:
        h_spec = pl.BlockSpec((tk, f_p), lambda i, k: (k, 0))
        h_vmem = 2 * tk * f_p * h_item

    row_spec = pl.BlockSpec((tm, f_p), lambda i, k: (i, 0))

    def const_spec(arr):
        return pl.BlockSpec(arr.shape, lambda i, k: (0, 0))

    consts = (w[0], b[0], w[1], b[1], w[2], b[2], wf, bfc)
    const_bytes = sum(int(a.size) * jnp.dtype(a.dtype).itemsize for a in consts)

    need = (2 * tm * tk * adj_item + h_vmem
            + 2 * 2 * tm * f_p * h_item      # p1 / p2 row tiles, double-buffered
            + 2 * const_bytes                # resident weights (conservative)
            + 2 * tm * lp * 4                # output block
            + tm * f_p * 4)                  # f32 accumulator scratch

    return pl.pallas_call(
        functools.partial(_final_hop_head_kernel, bf16=bf16,
                          resident_h=resident_h, tk=tk),
        out_shape=jax.ShapeDtypeStruct((n_p, lp), jnp.float32),
        grid_spec=pltpu.PrefetchScalarGridSpec(
            num_scalar_prefetch=0,
            grid=(n_p // tm, n_p // tk),
            in_specs=[pl.BlockSpec((tm, tk), lambda i, k: (i, k)),  # adj tile
                      h_spec,                                       # p2 (propagated)
                      row_spec,                                     # p1 row tile
                      row_spec]                                     # p2 row tile
                     + [const_spec(a) for a in consts],
            out_specs=pl.BlockSpec((tm, lp), lambda i, k: (i, 0)),
            scratch_shapes=[pltpu.VMEM((tm, f_p), jnp.float32)],
        ),
        compiler_params=pltpu.CompilerParams(
            dimension_semantics=("parallel", "arbitrary"),
            vmem_limit_bytes=_vmem_limit(need),
        ),
        cost_estimate=pl.CostEstimate(
            flops=(2 * n_p * n_p * f_p            # adj @ p2
                   + 3 * 2 * n_p * f_p * hp       # three branch linears
                   + 2 * n_p * 3 * hp * lp),      # fused fc
            transcendentals=n_p * lp,
            bytes_accessed=(n_p * n_p * adj_item + 3 * n_p * f_p * h_item
                            + const_bytes + n_p * lp * 4),
        ),
    )(adj, p2, p1, p2, *consts)


# --------------------------------------------------------------------------- #
# Full forward
# --------------------------------------------------------------------------- #
def _ngcn_forward_impl(x, adj, params, precision="f32"):
    bf16 = precision == "bf16"
    n = x.shape[0]
    nfeat = x.shape[1]
    nhid = params["w1"].shape[1]
    nlabel = params["bfc"].shape[1]

    n_p = _round_up(max(n, 256), 256)   # tiles always divide; >= 2 row blocks
    f_p = _round_up(nfeat, 128)         # lane-dense feature slab
    hp = _round_up(nhid, 128)           # lane-dense hidden width
    lp = _round_up(nlabel, 128)         # lane-dense output width (sliced below)

    cdt = jnp.bfloat16 if bf16 else jnp.float32

    adj_p = _pad2d(adj, n_p, n_p).astype(cdt)
    x_p = _pad2d(x, n_p, f_p).astype(cdt)

    # TODO(synk): when nfeat >> 3*nhid (Cora-scale), reassociate
    # (A^k x) W_k = A^k (x W_k) to propagate <=3*hp-lane activations instead.
    # TODO(synk): fp8 (v7x) / int8+scale (v5e/v6e) adjacency compression would
    # further cut the dominant HBM stream; left at bf16 here.

    # Reused propagation chain: hops 1-2 standalone, hop 3 fused with the head.
    p1 = _propagate(adj_p, x_p, bf16=bf16)
    p2 = _propagate(adj_p, p1, bf16=bf16)

    # Host-side zero-padding + stacked fc weight (no in-kernel slicing/relayout).
    w = [_pad2d(params["w%d" % k], f_p, hp).astype(cdt) for k in (1, 2, 3)]
    b = [_pad2d(params["b%d" % k], 1, hp).astype(jnp.float32) for k in (1, 2, 3)]
    wfc = params["wfc"]
    wf = jnp.concatenate(
        [_pad2d(wfc[k * nhid:(k + 1) * nhid, :], hp, lp) for k in range(3)],
        axis=0).astype(cdt)
    bfc = _pad2d(params["bfc"], 1, lp).astype(jnp.float32)

    out_padded = _final_hop_head(adj_p, p1, p2, w, b, wf, bfc, bf16=bf16)
    return out_padded[:n, :nlabel]


ngcn_forward = jax.jit(_ngcn_forward_impl, static_argnames=("precision",))


def ngcn_reference(x, adj, params):
    """Pure-JAX reference of the same forward pass (eval mode)."""
    outs = []
    for k, (w, b) in enumerate([(params["w1"], params["b1"]),
                                (params["w2"], params["b2"]),
                                (params["w3"], params["b3"])], start=1):
        h = x
        for _ in range(k):
            h = adj @ h
        outs.append(h @ w + b)
    h = jax.nn.relu(jnp.concatenate(outs, axis=1))
    return jax.nn.sigmoid(h @ params["wfc"] + params["bfc"])


if __name__ == "__main__":
    # Small, deterministic problem: 64 nodes, 32 features, 32 hidden, 8 labels.
    N, NFEAT, NHID, NLABEL = 64, 32, 32, 8

    key = jax.random.PRNGKey(0)
    kx, ka, k1, k2, k3, kfc = jax.random.split(key, 6)

    x = jax.random.normal(kx, (N, NFEAT), dtype=jnp.float32)

    # symmetric row-normalized dense adjacency (with self-loops)
    a = jax.random.uniform(ka, (N, N), dtype=jnp.float32)
    a = (a + a.T) * 0.5 + jnp.eye(N, dtype=jnp.float32)
    adj = a / jnp.sum(a, axis=1, keepdims=True)

    def init_linear(k, fan_in, fan_out):
        kw, kb = jax.random.split(k)
        bound = 1.0 / jnp.sqrt(fan_in)
        w = jax.random.uniform(kw, (fan_in, fan_out), minval=-bound, maxval=bound,
                               dtype=jnp.float32)
        b = jax.random.uniform(kb, (1, fan_out), minval=-bound, maxval=bound,
                               dtype=jnp.float32)
        return w, b

    w1, b1 = init_linear(k1, NFEAT, NHID)
    w2, b2 = init_linear(k2, NFEAT, NHID)
    w3, b3 = init_linear(k3, NFEAT, NHID)
    wfc, bfc = init_linear(kfc, NHID * 3, NLABEL)

    params = dict(w1=w1, b1=b1, w2=w2, b2=b2, w3=w3, b3=b3, wfc=wfc, bfc=bfc)

    ref = ngcn_reference(x, adj, params)

    # f32 path (faithful to the PyTorch module's dtype semantics).
    out = jax.block_until_ready(ngcn_forward(x, adj, params, precision="f32"))
    assert out.shape == (N, NLABEL)
    assert jnp.allclose(out, ref, atol=2e-5, rtol=2e-5)

    # bf16 fast path (recommended on v5e/v6e/v7x: adj-HBM bound), f32 accumulation.
    out_bf16 = jax.block_until_ready(ngcn_forward(x, adj, params, precision="bf16"))
    assert out_bf16.shape == (N, NLABEL)
    assert jnp.allclose(out_bf16, ref, atol=5e-2)

    print("KERNEL_OK")
</pallas_src>

<mosaic_0001>
module attributes {stable_mosaic.version = 11 : i64} {
  func.func @_final_hop_head_kernel(%arg0: i32, %arg1: i32, %arg2: memref<128x256xf32, #tpu.memory_space<vmem>>, %arg3: memref<256x128xf32, #tpu.memory_space<vmem>>, %arg4: memref<128x128xf32, #tpu.memory_space<vmem>>, %arg5: memref<128x128xf32, #tpu.memory_space<vmem>>, %arg6: memref<128x128xf32, #tpu.memory_space<vmem>>, %arg7: memref<1x128xf32, #tpu.memory_space<vmem>>, %arg8: memref<128x128xf32, #tpu.memory_space<vmem>>, %arg9: memref<1x128xf32, #tpu.memory_space<vmem>>, %arg10: memref<128x128xf32, #tpu.memory_space<vmem>>, %arg11: memref<1x128xf32, #tpu.memory_space<vmem>>, %arg12: memref<384x128xf32, #tpu.memory_space<vmem>>, %arg13: memref<1x128xf32, #tpu.memory_space<vmem>>, %arg14: memref<128x128xf32, #tpu.memory_space<vmem>>, %arg15: memref<128x128xf32, #tpu.memory_space<vmem>>) attributes {dimension_semantics = [#tpu.dimension_semantics<parallel>, #tpu.dimension_semantics<arbitrary>], iteration_bounds = array<i64: 2, 1>, scalar_prefetch = 0 : i64, scratch_operands = 1 : i64, tpu.core_type = #tpu.core_type<tc>, window_params = [{transform_indices = @transform_0, window_bounds = array<i64: 128, 256>}, {pipeline_mode = #tpu.pipeline_mode<synchronous>, transform_indices = @transform_1, window_bounds = array<i64: 256, 128>}, {transform_indices = @transform_2, window_bounds = array<i64: 128, 128>}, {transform_indices = @transform_3, window_bounds = array<i64: 128, 128>}, {pipeline_mode = #tpu.pipeline_mode<synchronous>, transform_indices = @transform_4, window_bounds = array<i64: 128, 128>}, {pipeline_mode = #tpu.pipeline_mode<synchronous>, transform_indices = @transform_5, window_bounds = array<i64: 1, 128>}, {pipeline_mode = #tpu.pipeline_mode<synchronous>, transform_indices = @transform_6, window_bounds = array<i64: 128, 128>}, {pipeline_mode = #tpu.pipeline_mode<synchronous>, transform_indices = @transform_7, window_bounds = array<i64: 1, 128>}, {pipeline_mode = #tpu.pipeline_mode<synchronous>, transform_indices = @transform_8, window_bounds = array<i64: 128, 128>}, {pipeline_mode = #tpu.pipeline_mode<synchronous>, transform_indices = @transform_9, window_bounds = array<i64: 1, 128>}, {pipeline_mode = #tpu.pipeline_mode<synchronous>, transform_indices = @transform_10, window_bounds = array<i64: 384, 128>}, {pipeline_mode = #tpu.pipeline_mode<synchronous>, transform_indices = @transform_11, window_bounds = array<i64: 1, 128>}, {transform_indices = @transform_12, window_bounds = array<i64: 128, 128>}]} {
    %c0_i32 = arith.constant 0 : i32
    %0 = arith.cmpi eq, %arg1, %c0_i32 : i32
    %1 = arith.extui %0 : i1 to i32
    %c0_i32_0 = arith.constant 0 : i32
    %2 = arith.cmpi ne, %1, %c0_i32_0 : i32
    scf.if %2 {
      %cst_9 = arith.constant 0.000000e+00 : f32
      %15 = vector.broadcast %cst_9 : f32 to vector<128x128xf32>
      %c0_10 = arith.constant 0 : index
      %c0_11 = arith.constant 0 : index
      %16 = vector.load %arg15[%c0_10, %c0_11] : memref<128x128xf32, #tpu.memory_space<vmem>>, vector<128x128xf32>
      tpu.vector_store %arg15[%c0_10, %c0_11], %15 {strides = array<i32>} : memref<128x128xf32, #tpu.memory_space<vmem>>, vector<128x128xf32>,
    } else {
    }
    %c0 = arith.constant 0 : index
    %c0_1 = arith.constant 0 : index
    %3 = vector.load %arg2[%c0, %c0_1] : memref<128x256xf32, #tpu.memory_space<vmem>>, vector<128x256xf32>
    %c256_i32 = arith.constant 256 : i32
    %4 = arith.muli %arg1, %c256_i32 : i32
    %5 = tpu.assume_multiple %4, 256 : i32
    %6 = arith.index_cast %5 : i32 to index
    %c0_2 = arith.constant 0 : index
    %7 = vector.load %arg3[%6, %c0_2] : memref<256x128xf32, #tpu.memory_space<vmem>>, vector<256x128xf32>
    %c0_3 = arith.constant 0 : index
    %c0_4 = arith.constant 0 : index
    %8 = vector.load %arg15[%c0_3, %c0_4] : memref<128x128xf32, #tpu.memory_space<vmem>>, vector<128x128xf32>
    %cst = arith.constant dense<0.000000e+00> : vector<128x128xf32>
    %9 = tpu.matmul %3, %7, %cst {dimension_numbers = #tpu.dot_dimension_numbers<[1], [0], [0], [1], [0, 0, 1, 1], [], []>} : vector<128x256xf32>, vector<256x128xf32>, vector<128x128xf32> -> vector<128x128xf32>
    %10 = arith.addf %8, %9 : vector<128x128xf32>
    %c0_5 = arith.constant 0 : index
    %c0_6 = arith.constant 0 : index
    %11 = vector.load %arg15[%c0_5, %c0_6] : memref<128x128xf32, #tpu.memory_space<vmem>>, vector<128x128xf32>
    tpu.vector_store %arg15[%c0_5, %c0_6], %10 {strides = array<i32>} : memref<128x128xf32, #tpu.memory_space<vmem>>, vector<128x128xf32>,
    %c0_i32_7 = arith.constant 0 : i32
    %12 = arith.cmpi eq, %arg1, %c0_i32_7 : i32
    %13 = arith.extui %12 : i1 to i32
    %c0_i32_8 = arith.constant 0 : i32
    %14 = arith.cmpi ne, %13, %c0_i32_8 : i32
    scf.if %14 {
      %c0_9 = arith.constant 0 : index
      %c0_10 = arith.constant 0 : index
      %15 = vector.load %arg15[%c0_9, %c0_10] : memref<128x128xf32, #tpu.memory_space<vmem>>, vector<128x128xf32>
      %c0_11 = arith.constant 0 : index
      %c0_12 = arith.constant 0 : index
      %16 = vector.load %arg4[%c0_11, %c0_12] : memref<128x128xf32, #tpu.memory_space<vmem>>, vector<128x128xf32>
      %c0_13 = arith.constant 0 : index
      %c0_14 = arith.constant 0 : index
      %17 = vector.load %arg6[%c0_13, %c0_14] : memref<128x128xf32, #tpu.memory_space<vmem>>, vector<128x128xf32>
      %cst_15 = arith.constant dense<0.000000e+00> : vector<128x128xf32>
      %18 = tpu.matmul %16, %17, %cst_15 {dimension_numbers = #tpu.dot_dimension_numbers<[1], [0], [0], [1], [0, 0, 1, 1], [], []>} : vector<128x128xf32>, vector<128x128xf32>, vector<128x128xf32> -> vector<128x128xf32>
      %c0_16 = arith.constant 0 : index
      %c0_17 = arith.constant 0 : index
      %19 = vector.load %arg7[%c0_16, %c0_17] : memref<1x128xf32, #tpu.memory_space<vmem>>, vector<1x128xf32>
      %20 = vector.broadcast %19 : vector<1x128xf32> to vector<128x128xf32>
      %21 = arith.addf %18, %20 : vector<128x128xf32>
      %cst_18 = arith.constant 0.000000e+00 : f32
      %22 = vector.broadcast %cst_18 : f32 to vector<128x128xf32>
      %23 = arith.maximumf %21, %22 : vector<128x128xf32>
      %c0_19 = arith.constant 0 : index
      %c0_20 = arith.constant 0 : index
      %24 = vector.load %arg5[%c0_19, %c0_20] : memref<128x128xf32, #tpu.memory_space<vmem>>, vector<128x128xf32>
      %c0_21 = arith.constant 0 : index
      %c0_22 = arith.constant 0 : index
      %25 = vector.load %arg8[%c0_21, %c0_22] : memref<128x128xf32, #tpu.memory_space<vmem>>, vector<128x128xf32>
      %cst_23 = arith.constant dense<0.000000e+00> : vector<128x128xf32>
      %26 = tpu.matmul %24, %25, %cst_23 {dimension_numbers = #tpu.dot_dimension_numbers<[1], [0], [0], [1], [0, 0, 1, 1], [], []>} : vector<128x128xf32>, vector<128x128xf32>, vector<128x128xf32> -> vector<128x128xf32>
      %c0_24 = arith.constant 0 : index
      %c0_25 = arith.constant 0 : index
      %27 = vector.load %arg9[%c0_24, %c0_25] : memref<1x128xf32, #tpu.memory_space<vmem>>, vector<1x128xf32>
      %28 = vector.broadcast %27 : vector<1x128xf32> to vector<128x128xf32>
      %29 = arith.addf %26, %28 : vector<128x128xf32>
      %cst_26 = arith.constant 0.000000e+00 : f32
      %30 = vector.broadcast %cst_26 : f32 to vector<128x128xf32>
      %31 = arith.maximumf %29, %30 : vector<128x128xf32>
      %c0_27 = arith.constant 0 : index
      %c0_28 = arith.constant 0 : index
      %32 = vector.load %arg10[%c0_27, %c0_28] : memref<128x128xf32, #tpu.memory_space<vmem>>, vector<128x128xf32>
      %cst_29 = arith.constant dense<0.000000e+00> : vector<128x128xf32>
      %33 = tpu.matmul %15, %32, %cst_29 {dimension_numbers = #tpu.dot_dimension_numbers<[1], [0], [0], [1], [0, 0, 1, 1], [], []>} : vector<128x128xf32>, vector<128x128xf32>, vector<128x128xf32> -> vector<128x128xf32>
      %c0_30 = arith.constant 0 : index
      %c0_31 = arith.constant 0 : index
      %34 = vector.load %arg11[%c0_30, %c0_31] : memref<1x128xf32, #tpu.memory_space<vmem>>, vector<1x128xf32>
      %35 = vector.broadcast %34 : vector<1x128xf32> to vector<128x128xf32>
      %36 = arith.addf %33, %35 : vector<128x128xf32>
      %cst_32 = arith.constant 0.000000e+00 : f32
      %37 = vector.broadcast %cst_32 : f32 to vector<128x128xf32>
      %38 = arith.maximumf %36, %37 : vector<128x128xf32>
      %39 = tpu.concatenate %23, %31, %38 in 1 : vector<128x128xf32>, vector<128x128xf32>, vector<128x128xf32> -> vector<128x384xf32>
      %c0_33 = arith.constant 0 : index
      %c0_34 = arith.constant 0 : index
      %40 = vector.load %arg12[%c0_33, %c0_34] : memref<384x128xf32, #tpu.memory_space<vmem>>, vector<384x128xf32>
      %cst_35 = arith.constant dense<0.000000e+00> : vector<128x128xf32>
      %41 = tpu.matmul %39, %40, %cst_35 {dimension_numbers = #tpu.dot_dimension_numbers<[1], [0], [0], [1], [0, 0, 1, 1], [], []>} : vector<128x384xf32>, vector<384x128xf32>, vector<128x128xf32> -> vector<128x128xf32>
      %c0_36 = arith.constant 0 : index
      %c0_37 = arith.constant 0 : index
      %42 = vector.load %arg13[%c0_36, %c0_37] : memref<1x128xf32, #tpu.memory_space<vmem>>, vector<1x128xf32>
      %43 = vector.broadcast %42 : vector<1x128xf32> to vector<128x128xf32>
      %44 = arith.addf %41, %43 : vector<128x128xf32>
      %45 = arith.negf %44 : vector<128x128xf32>
      %46 = math.exp %45 : vector<128x128xf32>
      %cst_38 = arith.constant 1.000000e+00 : f32
      %47 = vector.broadcast %cst_38 : f32 to vector<128x128xf32>
      %48 = arith.addf %47, %46 : vector<128x128xf32>
      %49 = arith.divf %47, %48 : vector<128x128xf32>
      %c0_39 = arith.constant 0 : index
      %c0_40 = arith.constant 0 : index
      %50 = vector.load %arg14[%c0_39, %c0_40] : memref<128x128xf32, #tpu.memory_space<vmem>>, vector<128x128xf32>
      tpu.vector_store %arg14[%c0_39, %c0_40], %49 {strides = array<i32>} : memref<128x128xf32, #tpu.memory_space<vmem>>, vector<128x128xf32>,
    } else {
    }
    return
  }
  func.func @transform_0(%arg0: i32, %arg1: i32) -> (i32, i32) {
    %c0_i32 = arith.constant 0 : i32
    return %arg0, %arg1 : i32, i32
  }
  func.func @transform_1(%arg0: i32, %arg1: i32) -> (i32, i32) {
    %c0_i32 = arith.constant 0 : i32
    %c0_i32_0 = arith.constant 0 : i32
    %c0_i32_1 = arith.constant 0 : i32
    return %c0_i32, %c0_i32_0 : i32, i32
  }
  func.func @transform_2(%arg0: i32, %arg1: i32) -> (i32, i32) {
    %c0_i32 = arith.constant 0 : i32
    %c0_i32_0 = arith.constant 0 : i32
    return %arg0, %c0_i32 : i32, i32
  }
  func.func @transform_3(%arg0: i32, %arg1: i32) -> (i32, i32) {
    %c0_i32 = arith.constant 0 : i32
    %c0_i32_0 = arith.constant 0 : i32
    return %arg0, %c0_i32 : i32, i32
  }
  func.func @transform_4(%arg0: i32, %arg1: i32) -> (i32, i32) {
    %c0_i32 = arith.constant 0 : i32
    %c0_i32_0 = arith.constant 0 : i32
    %c0_i32_1 = arith.constant 0 : i32
    return %c0_i32, %c0_i32_0 : i32, i32
  }
  func.func @transform_5(%arg0: i32, %arg1: i32) -> (i32, i32) {
    %c0_i32 = arith.constant 0 : i32
    %c0_i32_0 = arith.constant 0 : i32
    %c0_i32_1 = arith.constant 0 : i32
    return %c0_i32, %c0_i32_0 : i32, i32
  }
  func.func @transform_6(%arg0: i32, %arg1: i32) -> (i32, i32) {
    %c0_i32 = arith.constant 0 : i32
    %c0_i32_0 = arith.constant 0 : i32
    %c0_i32_1 = arith.constant 0 : i32
    return %c0_i32, %c0_i32_0 : i32, i32
  }
  func.func @transform_7(%arg0: i32, %arg1: i32) -> (i32, i32) {
    %c0_i32 = arith.constant 0 : i32
    %c0_i32_0 = arith.constant 0 : i32
    %c0_i32_1 = arith.constant 0 : i32
    return %c0_i32, %c0_i32_0 : i32, i32
  }
  func.func @transform_8(%arg0: i32, %arg1: i32) -> (i32, i32) {
    %c0_i32 = arith.constant 0 : i32
    %c0_i32_0 = arith.constant 0 : i32
    %c0_i32_1 = arith.constant 0 : i32
    return %c0_i32, %c0_i32_0 : i32, i32
  }
  func.func @transform_9(%arg0: i32, %arg1: i32) -> (i32, i32) {
    %c0_i32 = arith.constant 0 : i32
    %c0_i32_0 = arith.constant 0 : i32
    %c0_i32_1 = arith.constant 0 : i32
    return %c0_i32, %c0_i32_0 : i32, i32
  }
  func.func @transform_10(%arg0: i32, %arg1: i32) -> (i32, i32) {
    %c0_i32 = arith.constant 0 : i32
    %c0_i32_0 = arith.constant 0 : i32
    %c0_i32_1 = arith.constant 0 : i32
    return %c0_i32, %c0_i32_0 : i32, i32
  }
  func.func @transform_11(%arg0: i32, %arg1: i32) -> (i32, i32) {
    %c0_i32 = arith.constant 0 : i32
    %c0_i32_0 = arith.constant 0 : i32
    %c0_i32_1 = arith.constant 0 : i32
    return %c0_i32, %c0_i32_0 : i32, i32
  }
  func.func @transform_12(%arg0: i32, %arg1: i32) -> (i32, i32) {
    %c0_i32 = arith.constant 0 : i32
    %c0_i32_0 = arith.constant 0 : i32
    return %arg0, %c0_i32 : i32, i32
  }
}

module attributes {stable_mosaic.version = 11 : i64} {
  func.func @_propagate_kernel(%arg0: i32, %arg1: i32, %arg2: memref<128x256xf32, #tpu.memory_space<vmem>>, %arg3: memref<256x128xf32, #tpu.memory_space<vmem>>, %arg4: memref<128x128xf32, #tpu.memory_space<vmem>>, %arg5: memref<128x128xf32, #tpu.memory_space<vmem>>) attributes {dimension_semantics = [#tpu.dimension_semantics<parallel>, #tpu.dimension_semantics<arbitrary>], iteration_bounds = array<i64: 2, 1>, scalar_prefetch = 0 : i64, scratch_operands = 1 : i64, tpu.core_type = #tpu.core_type<tc>, window_params = [{transform_indices = @transform_0, window_bounds = array<i64: 128, 256>}, {pipeline_mode = #tpu.pipeline_mode<synchronous>, transform_indices = @transform_1, window_bounds = array<i64: 256, 128>}, {transform_indices = @transform_2, window_bounds = array<i64: 128, 128>}]} {
    %c0_i32 = arith.constant 0 : i32
    %0 = arith.cmpi eq, %arg1, %c0_i32 : i32
    %1 = arith.extui %0 : i1 to i32
    %c0_i32_0 = arith.constant 0 : i32
    %2 = arith.cmpi ne, %1, %c0_i32_0 : i32
    scf.if %2 {
      %cst_9 = arith.constant 0.000000e+00 : f32
      %15 = vector.broadcast %cst_9 : f32 to vector<128x128xf32>
      %c0_10 = arith.constant 0 : index
      %c0_11 = arith.constant 0 : index
      %16 = vector.load %arg5[%c0_10, %c0_11] : memref<128x128xf32, #tpu.memory_space<vmem>>, vector<128x128xf32>
      tpu.vector_store %arg5[%c0_10, %c0_11], %15 {strides = array<i32>} : memref<128x128xf32, #tpu.memory_space<vmem>>, vector<128x128xf32>,
    } else {
    }
    %c0 = arith.constant 0 : index
    %c0_1 = arith.constant 0 : index
    %3 = vector.load %arg2[%c0, %c0_1] : memref<128x256xf32, #tpu.memory_space<vmem>>, vector<128x256xf32>
    %c256_i32 = arith.constant 256 : i32
    %4 = arith.muli %arg1, %c256_i32 : i32
    %5 = tpu.assume_multiple %4, 256 : i32
    %6 = arith.index_cast %5 : i32 to index
    %c0_2 = arith.constant 0 : index
    %7 = vector.load %arg3[%6, %c0_2] : memref<256x128xf32, #tpu.memory_space<vmem>>, vector<256x128xf32>
    %c0_3 = arith.constant 0 : index
    %c0_4 = arith.constant 0 : index
    %8 = vector.load %arg5[%c0_3, %c0_4] : memref<128x128xf32, #tpu.memory_space<vmem>>, vector<128x128xf32>
    %cst = arith.constant dense<0.000000e+00> : vector<128x128xf32>
    %9 = tpu.matmul %3, %7, %cst {dimension_numbers = #tpu.dot_dimension_numbers<[1], [0], [0], [1], [0, 0, 1, 1], [], []>} : vector<128x256xf32>, vector<256x128xf32>, vector<128x128xf32> -> vector<128x128xf32>
    %10 = arith.addf %8, %9 : vector<128x128xf32>
    %c0_5 = arith.constant 0 : index
    %c0_6 = arith.constant 0 : index
    %11 = vector.load %arg5[%c0_5, %c0_6] : memref<128x128xf32, #tpu.memory_space<vmem>>, vector<128x128xf32>
    tpu.vector_store %arg5[%c0_5, %c0_6], %10 {strides = array<i32>} : memref<128x128xf32, #tpu.memory_space<vmem>>, vector<128x128xf32>,
    %c0_i32_7 = arith.constant 0 : i32
    %12 = arith.cmpi eq, %arg1, %c0_i32_7 : i32
    %13 = arith.extui %12 : i1 to i32
    %c0_i32_8 = arith.constant 0 : i32
    %14 = arith.cmpi ne, %13, %c0_i32_8 : i32
    scf.if %14 {
      %c0_9 = arith.constant 0 : index
      %c0_10 = arith.constant 0 : index
      %15 = vector.load %arg5[%c0_9, %c0_10] : memref<128x128xf32, #tpu.memory_space<vmem>>, vector<128x128xf32>
      %c0_11 = arith.constant 0 : index
      %c0_12 = arith.constant 0 : index
      %16 = vector.load %arg4[%c0_11, %c0_12] : memref<128x128xf32, #tpu.memory_space<vmem>>, vector<128x128xf32>
      tpu.vector_store %arg4[%c0_11, %c0_12], %15 {strides = array<i32>} : memref<128x128xf32, #tpu.memory_space<vmem>>, vector<128x128xf32>,
    } else {
    }
    return
  }
  func.func @transform_0(%arg0: i32, %arg1: i32) -> (i32, i32) {
    %c0_i32 = arith.constant 0 : i32
    return %arg0, %arg1 : i32, i32
  }
  func.func @transform_1(%arg0: i32, %arg1: i32) -> (i32, i32) {
    %c0_i32 = arith.constant 0 : i32
    %c0_i32_0 = arith.constant 0 : i32
    %c0_i32_1 = arith.constant 0 : i32
    return %c0_i32, %c0_i32_0 : i32, i32
  }
  func.func @transform_2(%arg0: i32, %arg1: i32) -> (i32, i32) {
    %c0_i32 = arith.constant 0 : i32
    %c0_i32_0 = arith.constant 0 : i32
    return %arg0, %c0_i32 : i32, i32
  }
}

</mosaic_0001>

<bundles_post_ra>
// kernel: _ngcn_forward_impl.3
= control target key start
LH: loop header
LB: loop body
LE: loop exit
PB: predicated region body
PF: predicated region fallthrough
CT: control target
= control target key end

     0   :  { %s658_s9 = smov 0   ;;  %s660_s10 = smov 0   ;;  %s846_s0 = inlined_call_operand.vmem [shape: f32[256,256], index: 0, kind: input, shape index: {}]   ;;  %s847_s1 = inlined_call_operand.vmem [shape: f32[256,128], index: 1, kind: input, shape index: {}]   ;;  %s848_s2 = inlined_call_operand.vmem [shape: f32[256,128], index: 2, kind: output, shape index: {}]  }
   0x1   :  { %s662_s11 = smov 0  }
   0x2 LB: > { %s24_s12 = sadd.s32 1, %s637_s10  ;;  %p554_p0 = scmp.ge.s32.totalorder %s641_s11, 1  ;;  %s641_s11 = sphi %s662_s11, %s12_s11   ;;  %s637_s10 = sphi %s660_s10, %s850_s10   ;;  %s633_s9 = sphi %s658_s9, %s849_s9  }
   0x3   : > { %p26_p1 = scmp.ge.s32.totalorder %s24_s12, 2  ;;  %p133_p2 = scmp.lt.s32.totalorder %s641_s11, 3 }
   0x5   : > { %s852_s12 = smov (%p26_p1, %s24_s12), 0  ;;  %p134_p3 = pnand %p554_p0, %p133_p2 }
   0x6   : > { %s555_s21 = sshll.u32 (!%p134_p3), %s633_s9, 4 }
   0x7   : > { %137 = sbr.rel (%p134_p3) target bundleno = 236 (0xec), region = 28  ;;  %p162_p4 = scmp.lt.s32.totalorder (!%p134_p3), %s555_s21, 31 }
   0xc   : > { %v247_v0 = vld [vmem:[%s847_s1 + $0x78] sm:$0xff]  ;;  %v246_v2 = vld [vmem:[%s847_s1 + $0x70] sm:$0xff]  ;;  %v245_v4 = vld [vmem:[%s847_s1 + $0x68] sm:$0xff]  ;;  %s854_s21 = smov (!%p162_p4, %s555_s21), 31 }
   0xd   : > { %v263_v1 = vld [vmem:[%s847_s1 + $0xf8] sm:$0xff]  ;;  %563 = vmatpush.msra.mxu2 %v247_v0  ;;  %v262_v3 = vld [vmem:[%s847_s1 + $0xf0] sm:$0xff]  ;;  %v261_v5 = vld [vmem:[%s847_s1 + $0xe8] sm:$0xff]  ;;  %280 = vmatpush.msra.mxu0 %v247_v0  ;;  %s562_s17 = sshll.u32 %s854_s21, 4  ;;  %s559_s5 = sshll.u32 %s854_s21, 3 }
   0xe   : > { %579 = vmatpush.msra.mxu3 %v263_v1  ;;  %345 = vmatpush.msra.mxu1 %v263_v1  ;;  %v244_v6 = vld [vmem:[%s847_s1 + $0x60] sm:$0xff]  ;;  %v243_v8 = vld [vmem:[%s847_s1 + $0x58] sm:$0xff]  ;;  %v242_v10 = vld [vmem:[%s847_s1 + $0x50] sm:$0xff]  ;;  %s775_s28 = scalar_lea.vmem %s846_s0, %s562_s17  ;;  %s819_s8 = scalar_lea.vmem %s848_s2, %s559_s5 }
   0xf   : > { %564 = vmatpush.msra.mxu2 %v246_v2  ;;  %v260_v7 = vld [vmem:[%s847_s1 + $0xe0] sm:$0xff]  ;;  %281 = vmatpush.msra.mxu0 %v246_v2  ;;  %v259_v9 = vld [vmem:[%s847_s1 + $0xd8] sm:$0xff]  ;;  %v258_v11 = vld [vmem:[%s847_s1 + $0xd0] sm:$0xff] }
  0x10   : > { %580 = vmatpush.msra.mxu3 %v262_v3  ;;  %346 = vmatpush.msra.mxu1 %v262_v3  ;;  %v241_v12 = vld [vmem:[%s847_s1 + $0x48] sm:$0xff]  ;;  %v240_v14 = vld [vmem:[%s847_s1 + $0x40] sm:$0xff]  ;;  %v239_v16 = vld [vmem:[%s847_s1 + $0x38] sm:$0xff] }
  0x11   : > { %565 = vmatpush.msra.mxu2 %v245_v4  ;;  %282 = vmatpush.msra.mxu0 %v245_v4  ;;  %v257_v13 = vld [vmem:[%s847_s1 + $0xc8] sm:$0xff]  ;;  %v256_v15 = vld [vmem:[%s847_s1 + $0xc0] sm:$0xff]  ;;  %v255_v17 = vld [vmem:[%s847_s1 + $0xb8] sm:$0xff] }
  0x12   : > { %581 = vmatpush.msra.mxu3 %v261_v5  ;;  %347 = vmatpush.msra.mxu1 %v261_v5  ;;  %v238_v18 = vld [vmem:[%s847_s1 + $0x30] sm:$0xff]  ;;  %v237_v20 = vld [vmem:[%s847_s1 + $0x28] sm:$0xff]  ;;  %v236_v22 = vld [vmem:[%s847_s1 + $0x20] sm:$0xff] }
  0x13   : > { %566 = vmatpush.msra.mxu2 %v244_v6  ;;  %283 = vmatpush.msra.mxu0 %v244_v6  ;;  %v254_v19 = vld [vmem:[%s847_s1 + $0xb0] sm:$0xff]  ;;  %v253_v21 = vld [vmem:[%s847_s1 + $0xa8] sm:$0xff]  ;;  %v252_v23 = vld [vmem:[%s847_s1 + $0xa0] sm:$0xff] }
  0x14   : > { %582 = vmatpush.msra.mxu3 %v260_v7  ;;  %348 = vmatpush.msra.mxu1 %v260_v7  ;;  %v235_v24 = vld [vmem:[%s847_s1 + $0x18] sm:$0xff]  ;;  %v234_v26 = vld [vmem:[%s847_s1 + $0x10] sm:$0xff]  ;;  %v233_v28 = vld [vmem:[%s847_s1 + $0x8] sm:$0xff] }
  0x15   : > { %567 = vmatpush.msra.mxu2 %v243_v8  ;;  %284 = vmatpush.msra.mxu0 %v243_v8  ;;  %v251_v25 = vld [vmem:[%s847_s1 + $0x98] sm:$0xff]  ;;  %v250_v27 = vld [vmem:[%s847_s1 + $0x90] sm:$0xff]  ;;  %v249_v29 = vld [vmem:[%s847_s1 + $0x88] sm:$0xff] }
  0x16   : > { %583 = vmatpush.msra.mxu3 %v259_v9  ;;  %349 = vmatpush.msra.mxu1 %v259_v9  ;;  %v232_v30 = vld [vmem:[%s847_s1] sm:$0xff]  ;;  %v215_v33 = vld [vmem:[%s775_s28 + $0x88] sm:$0xff]  ;;  %v216_v36 = vld [vmem:[%s775_s28 + $0x90] sm:$0xff] }
  0x17   : > { %568 = vmatpush.msra.mxu2 %v242_v10  ;;  %285 = vmatpush.msra.mxu0 %v242_v10  ;;  %v248_v31 = vld [vmem:[%s847_s1 + $0x80] sm:$0xff]  ;;  %v199_v35 = vld [vmem:[%s775_s28 + $0x8] sm:$0xff]  ;;  %v217_v37 = vld [vmem:[%s775_s28 + $0x98] sm:$0xff] }
  0x18   : > { %584 = vmatpush.msra.mxu3 %v258_v11  ;;  %350 = vmatpush.msra.mxu1 %v258_v11  ;;  %v214_v32 = vld [vmem:[%s775_s28 + $0x80] sm:$0xff]  ;;  %v200_v38 = vld [vmem:[%s775_s28 + $0x10] sm:$0xff]  ;;  %v201_v39 = vld [vmem:[%s775_s28 + $0x18] sm:$0xff] }
  0x19   : > { %569 = vmatpush.msra.mxu2 %v241_v12  ;;  %286 = vmatpush.msra.mxu0 %v241_v12  ;;  %v198_v34 = vld [vmem:[%s775_s28] sm:$0xff]  ;;  %v219_v41 = vld [vmem:[%s775_s28 + $0xa8] sm:$0xff]  ;;  %v220_v44 = vld [vmem:[%s775_s28 + $0xb0] sm:$0xff] }
  0x1a   : > { %585 = vmatpush.msra.mxu3 %v257_v13  ;;  %351 = vmatpush.msra.mxu1 %v257_v13  ;;  %v218_v40 = vld [vmem:[%s775_s28 + $0xa0] sm:$0xff]  ;;  %v203_v43 = vld [vmem:[%s775_s28 + $0x28] sm:$0xff]  ;;  %v221_v45 = vld [vmem:[%s775_s28 + $0xb8] sm:$0xff] }
  0x1b   : > { %570 = vmatpush.msra.mxu2 %v240_v14  ;;  %287 = vmatpush.msra.mxu0 %v240_v14  ;;  %v202_v42 = vld [vmem:[%s775_s28 + $0x20] sm:$0xff]  ;;  %v204_v46 = vld [vmem:[%s775_s28 + $0x30] sm:$0xff]  ;;  %v205_v47 = vld [vmem:[%s775_s28 + $0x38] sm:$0xff] }
  0x1c   : > { %586 = vmatpush.msra.mxu3 %v256_v15  ;;  %352 = vmatpush.msra.mxu1 %v256_v15  ;;  %v222_v48 = vld [vmem:[%s775_s28 + $0xc0] sm:$0xff]  ;;  %v223_v49 = vld [vmem:[%s775_s28 + $0xc8] sm:$0xff]  ;;  %v224_v52 = vld [vmem:[%s775_s28 + $0xd0] sm:$0xff] }
  0x1d   : > { %571 = vmatpush.msra.mxu2 %v239_v16  ;;  %288 = vmatpush.msra.mxu0 %v239_v16  ;;  %v206_v50 = vld [vmem:[%s775_s28 + $0x40] sm:$0xff]  ;;  %v207_v51 = vld [vmem:[%s775_s28 + $0x48] sm:$0xff]  ;;  %v225_v53 = vld [vmem:[%s775_s28 + $0xd8] sm:$0xff] }
  0x1e   : > { %587 = vmatpush.msra.mxu3 %v255_v17  ;;  %353 = vmatpush.msra.mxu1 %v255_v17  ;;  %v208_v54 = vld [vmem:[%s775_s28 + $0x50] sm:$0xff]  ;;  %v209_v55 = vld [vmem:[%s775_s28 + $0x58] sm:$0xff]  ;;  %v226_v56 = vld [vmem:[%s775_s28 + $0xe0] sm:$0xff] }
  0x1f   : > { %572 = vmatpush.msra.mxu2 %v238_v18  ;;  %289 = vmatpush.msra.mxu0 %v238_v18  ;;  %v227_v57 = vld [vmem:[%s775_s28 + $0xe8] sm:$0xff]  ;;  %v210_v58 = vld [vmem:[%s775_s28 + $0x60] sm:$0xff]  ;;  %v228_v60 = vld [vmem:[%s775_s28 + $0xf0] sm:$0xff] }
  0x20   : > { %588 = vmatpush.msra.mxu3 %v254_v19  ;;  %354 = vmatpush.msra.mxu1 %v254_v19  ;;  %v211_v59 = vld [vmem:[%s775_s28 + $0x68] sm:$0xff]  ;;  %v229_v61 = vld [vmem:[%s775_s28 + $0xf8] sm:$0xff]  ;;  %v212_v62 = vld [vmem:[%s775_s28 + $0x70] sm:$0xff] }
  0x21   : > { %573 = vmatpush.msra.mxu2 %v237_v20  ;;  %290 = vmatpush.msra.mxu0 %v237_v20  ;;  %v213_v63 = vld [vmem:[%s775_s28 + $0x78] sm:$0xff] }
  0x22   : > { %589 = vmatpush.msra.mxu3 %v253_v21  ;;  %355 = vmatpush.msra.mxu1 %v253_v21 }
  0x23   : > { %574 = vmatpush.msra.mxu2 %v236_v22  ;;  %291 = vmatpush.msra.mxu0 %v236_v22 }
  0x24   : > { %590 = vmatpush.msra.mxu3 %v252_v23  ;;  %356 = vmatpush.msra.mxu1 %v252_v23 }
  0x25   : > { %575 = vmatpush.msra.mxu2 %v235_v24  ;;  %292 = vmatpush.msra.mxu0 %v235_v24 }
  0x26   : > { %591 = vmatpush.msra.mxu3 %v251_v25  ;;  %357 = vmatpush.msra.mxu1 %v251_v25 }
  0x27   : > { %576 = vmatpush.msra.mxu2 %v234_v26  ;;  %293 = vmatpush.msra.mxu0 %v234_v26 }
  0x28   : > { %592 = vmatpush.msra.mxu3 %v250_v27  ;;  %358 = vmatpush.msra.mxu1 %v250_v27 }
  0x29   : > { %577 = vmatpush.msra.mxu2 %v233_v28  ;;  %294 = vmatpush.msra.mxu0 %v233_v28 }
  0x2a   : > { %593 = vmatpush.msra.mxu3 %v249_v29  ;;  %359 = vmatpush.msra.mxu1 %v249_v29 }
  0x2b   : > { %578 = vmatpush.msra.mxu2 %v232_v30  ;;  %295 = vmatpush.msra.mxu0 %v232_v30 }
  0x2c   : > { %594 = vmatpush.msra.mxu3 %v248_v31  ;;  %320 = vmatmul.f32.vlgmr.msra.gmra.mxu2 %v214_v32 }
  0x2d   : > { %385 = vmatmul.f32.vlgmr.msra.gmra.mxu3 %v215_v33  ;;  %360 = vmatpush.msra.mxu1 %v248_v31 }
  0x2e   : > { %296 = vmatmul.f32.vlgmr.msra.gmra.mxu0 %v198_v34  ;;  %361 = vmatmul.f32.vlgmr.msra.gmra.mxu1 %v199_v35 }
  0x34   : > { %323 = vmatmul.f32.gmra.mxu2 %v216_v36 }
  0x35   : > { %388 = vmatmul.f32.gmra.mxu3 %v217_v37 }
  0x36   : > { %299 = vmatmul.f32.gmra.mxu0 %v200_v38  ;;  %364 = vmatmul.f32.gmra.mxu1 %v201_v39 }
  0x3c   : > { %326 = vmatmul.f32.gmra.mxu2 %v218_v40 }
  0x3d   : > { %391 = vmatmul.f32.gmra.mxu3 %v219_v41 }
  0x3e   : > { %302 = vmatmul.f32.gmra.mxu0 %v202_v42  ;;  %367 = vmatmul.f32.gmra.mxu1 %v203_v43 }
  0x44   : > { %329 = vmatmul.f32.gmra.mxu2 %v220_v44 }
  0x45   : > { %394 = vmatmul.f32.gmra.mxu3 %v221_v45 }
  0x46   : > { %305 = vmatmul.f32.gmra.mxu0 %v204_v46  ;;  %370 = vmatmul.f32.gmra.mxu1 %v205_v47 }
  0x4c   : > { %332 = vmatmul.f32.gmra.mxu2 %v222_v48 }
  0x4d   : > { %397 = vmatmul.f32.gmra.mxu3 %v223_v49 }
  0x4e   : > { %308 = vmatmul.f32.gmra.mxu0 %v206_v50  ;;  %373 = vmatmul.f32.gmra.mxu1 %v207_v51 }
  0x54   : > { %335 = vmatmul.f32.gmra.mxu2 %v224_v52 }
  0x55   : > { %400 = vmatmul.f32.gmra.mxu3 %v225_v53 }
  0x56   : > { %311 = vmatmul.f32.gmra.mxu0 %v208_v54  ;;  %376 = vmatmul.f32.gmra.mxu1 %v209_v55 }
  0x5c   : > { %338 = vmatmul.f32.gmra.mxu2 %v226_v56 }
  0x5d   : > { %403 = vmatmul.f32.gmra.mxu3 %v227_v57 }
  0x5e   : > { %314 = vmatmul.f32.gmra.mxu0 %v210_v58  ;;  %379 = vmatmul.f32.gmra.mxu1 %v211_v59 }
  0x64   : > { %341 = vmatmul.f32.gmra.mxu2 %v228_v60 }
  0x65   : > { %406 = vmatmul.f32.gmra.mxu3 %v229_v61 }
  0x66   : > { %317 = vmatmul.f32.gmra.mxu0 %v212_v62  ;;  %382 = vmatmul.f32.gmra.mxu1 %v213_v63 }
  0xab   : > { %v297_v0 = vpop.f32.mrf.mxu0  ;;  %v362_v1 = vpop.f32.mrf.mxu1 }
  0xac   : > { %v363_v2 = vadd.f32 %v362_v1, %v297_v0 }
  0xae   : > { %461 = vst [vmem:[%s819_s8] sm:$0xff] %v363_v2 }
  0xaf   : > { %v321_v3 = vpop.f32.mrf.mxu2 }
  0xb0   : > { %v386_v4 = vpop.f32.mrf.mxu3 }
  0xb1   : > { %v387_v5 = vadd.f32 %v386_v4, %v321_v3 }
  0xb3   : > { %469 = vst [vmem:[%s819_s8 + $0x40] sm:$0xff] %v387_v5  ;;  %v300_v6 = vpop.f32.mrf.mxu0  ;;  %v365_v7 = vpop.f32.mrf.mxu1 }
  0xb4   : > { %v366_v8 = vadd.f32 %v365_v7, %v300_v6 }
  0xb6   : > { %462 = vst [vmem:[%s819_s8 + $0x8] sm:$0xff] %v366_v8 }
  0xb7   : > { %v324_v9 = vpop.f32.mrf.mxu2 }
  0xb8   : > { %v389_v10 = vpop.f32.mrf.mxu3 }
  0xb9   : > { %v390_v11 = vadd.f32 %v389_v10, %v324_v9 }
  0xbb   : > { %470 = vst [vmem:[%s819_s8 + $0x48] sm:$0xff] %v390_v11  ;;  %v303_v12 = vpop.f32.mrf.mxu0  ;;  %v368_v13 = vpop.f32.mrf.mxu1 }
  0xbc   : > { %v369_v14 = vadd.f32 %v368_v13, %v303_v12 }
  0xbe   : > { %463 = vst [vmem:[%s819_s8 + $0x10] sm:$0xff] %v369_v14 }
  0xbf   : > { %v327_v15 = vpop.f32.mrf.mxu2 }
  0xc0   : > { %v392_v16 = vpop.f32.mrf.mxu3 }
  0xc1   : > { %v393_v17 = vadd.f32 %v392_v16, %v327_v15 }
  0xc3   : > { %471 = vst [vmem:[%s819_s8 + $0x50] sm:$0xff] %v393_v17  ;;  %v306_v18 = vpop.f32.mrf.mxu0  ;;  %v371_v19 = vpop.f32.mrf.mxu1 }
  0xc4   : > { %v372_v20 = vadd.f32 %v371_v19, %v306_v18 }
  0xc6   : > { %464 = vst [vmem:[%s819_s8 + $0x18] sm:$0xff] %v372_v20 }
  0xc7   : > { %v330_v21 = vpop.f32.mrf.mxu2 }
  0xc8   : > { %v395_v22 = vpop.f32.mrf.mxu3 }
  0xc9   : > { %v396_v23 = vadd.f32 %v395_v22, %v330_v21 }
  0xcb   : > { %472 = vst [vmem:[%s819_s8 + $0x58] sm:$0xff] %v396_v23  ;;  %v309_v24 = vpop.f32.mrf.mxu0  ;;  %v374_v25 = vpop.f32.mrf.mxu1 }
  0xcc   : > { %v375_v26 = vadd.f32 %v374_v25, %v309_v24 }
  0xce   : > { %465 = vst [vmem:[%s819_s8 + $0x20] sm:$0xff] %v375_v26 }
  0xcf   : > { %v333_v27 = vpop.f32.mrf.mxu2 }
  0xd0   : > { %v398_v28 = vpop.f32.mrf.mxu3 }
  0xd1   : > { %v399_v29 = vadd.f32 %v398_v28, %v333_v27 }
  0xd3   : > { %473 = vst [vmem:[%s819_s8 + $0x60] sm:$0xff] %v399_v29  ;;  %v312_v30 = vpop.f32.mrf.mxu0  ;;  %v377_v31 = vpop.f32.mrf.mxu1 }
  0xd4   : > { %v378_v32 = vadd.f32 %v377_v31, %v312_v30 }
  0xd6   : > { %466 = vst [vmem:[%s819_s8 + $0x28] sm:$0xff] %v378_v32 }
  0xd7   : > { %v336_v33 = vpop.f32.mrf.mxu2 }
  0xd8   : > { %v401_v34 = vpop.f32.mrf.mxu3 }
  0xd9   : > { %v402_v35 = vadd.f32 %v401_v34, %v336_v33 }
  0xdb   : > { %474 = vst [vmem:[%s819_s8 + $0x68] sm:$0xff] %v402_v35  ;;  %v315_v36 = vpop.f32.mrf.mxu0  ;;  %v380_v37 = vpop.f32.mrf.mxu1 }
  0xdc   : > { %v381_v38 = vadd.f32 %v380_v37, %v315_v36 }
  0xde   : > { %467 = vst [vmem:[%s819_s8 + $0x30] sm:$0xff] %v381_v38 }
  0xdf   : > { %v339_v39 = vpop.f32.mrf.mxu2 }
  0xe0   : > { %v404_v40 = vpop.f32.mrf.mxu3 }
  0xe1   : > { %v405_v41 = vadd.f32 %v404_v40, %v339_v39 }
  0xe3   : > { %475 = vst [vmem:[%s819_s8 + $0x70] sm:$0xff] %v405_v41  ;;  %v318_v42 = vpop.f32.mrf.mxu0  ;;  %v383_v43 = vpop.f32.mrf.mxu1 }
  0xe4   : > { %v384_v44 = vadd.f32 %v383_v43, %v318_v42 }
  0xe6   : > { %468 = vst [vmem:[%s819_s8 + $0x38] sm:$0xff] %v384_v44 }
  0xe7   : > { %v342_v45 = vpop.f32.mrf.mxu2 }
  0xe8   : > { %v407_v46 = vpop.f32.mrf.mxu3 }
  0xe9   : > { %v408_v47 = vadd.f32 %v407_v46, %v342_v45 }
  0xeb   : > { %476 = vst [vmem:[%s819_s8 + $0x78] sm:$0xff] %v408_v47 }
  0xec PF: > { %s12_s11 = sadd.s32 1, %s641_s11   ;;  %s849_s9 = smov %s637_s10 }
  0xed   : > { %p9_p5 = scmp.ge.s32.totalorder %s12_s11, 4   ;;  %s850_s10 = smov %s852_s12 }
  0xef   :  { %11 = sbr.rel (!%p9_p5) target bundleno = 2 (0x2), region = 67 }

// kernel: _ngcn_forward_impl.5
= control target key start
LH: loop header
LB: loop body
LE: loop exit
PB: predicated region body
PF: predicated region fallthrough
CT: control target
= control target key end

     0   :  { %s1988_s21 = smov 0   ;;  %s1990_s22 = smov 0   ;;  %s2601_s0 = inlined_call_operand.vmem [shape: f32[256,256], index: 0, kind: input, shape index: {}]   ;;  %s2602_s1 = inlined_call_operand.vmem [shape: f32[256,128], index: 1, kind: input, shape index: {}, may-alias: {1,3}]   ;;  %s2603_s2 = inlined_call_operand.vmem [shape: f32[256,128], index: 2, kind: input, shape index: {}]   ;;  %s2604_s3 = inlined_call_operand.vmem [shape: f32[256,128], index: 3, kind: input, shape index: {}, may-alias: {1,3}]   ;;  %s2605_s4 = inlined_call_operand.vmem [shape: f32[128,128], index: 4, kind: input, shape index: {}]   ;;  %s2606_s5 = inlined_call_operand.vmem [shape: f32[1,128], index: 5, kind: input, shape index: {}]   ;;  %s2607_s6 = inlined_call_operand.vmem [shape: f32[128,128], index: 6, kind: input, shape index: {}]   ;;  %s2608_s7 = inlined_call_operand.vmem [shape: f32[1,128], index: 7, kind: input, shape index: {}]   ;;  %s2609_s8 = inlined_call_operand.vmem [shape: f32[128,128], index: 8, kind: input, shape index: {}]   ;;  %s2610_s9 = inlined_call_operand.vmem [shape: f32[1,128], index: 9, kind: input, shape index: {}]   ;;  %s2611_s10 = inlined_call_operand.vmem [shape: f32[384,128], index: 10, kind: input, shape index: {}]   ;;  %s2612_s11 = inlined_call_operand.vmem [shape: f32[1,128], index: 11, kind: input, shape index: {}]   ;;  %s2613_s12 = inlined_call_operand.vmem [shape: f32[256,128], index: 12, kind: output, shape index: {}]  }
   0x1   :  { %s1992_s23 = smov 0  }
   0x2 LB: > { %s34_s24 = sadd.s32 1, %s1917_s22  ;;  %p1778_p0 = scmp.ge.s32.totalorder %s1921_s23, 1  ;;  %s1921_s23 = sphi %s1992_s23, %s22_s23   ;;  %s1917_s22 = sphi %s1990_s22, %s2615_s22   ;;  %s1913_s21 = sphi %s1988_s21, %s2614_s21  }
   0x3   : > { %p36_p1 = scmp.ge.s32.totalorder %s34_s24, 2  ;;  %p405_p2 = scmp.lt.s32.totalorder %s1921_s23, 3 }
   0x5   : > { %s2617_s24 = smov (%p36_p1, %s34_s24), 0  ;;  %p406_p3 = pnand %p1778_p0, %p405_p2 }
   0x6   : > { %s1779_s29 = sshll.u32 (!%p406_p3), %s1913_s21, 4 }
   0x7   : > { %409 = sbr.rel (%p406_p3) target bundleno = 586 (0x24a), region = 68  ;;  %p464_p4 = scmp.lt.s32.totalorder (!%p406_p3), %s1779_s29, 31 }
   0xc   : > { %v561_v0 = vld [vmem:[%s2602_s1 + $0x78] sm:$0xff]  ;;  %v560_v2 = vld [vmem:[%s2602_s1 + $0x70] sm:$0xff]  ;;  %v559_v4 = vld [vmem:[%s2602_s1 + $0x68] sm:$0xff]  ;;  %s2619_s29 = smov (!%p464_p4, %s1779_s29), 31 }
   0xd   : > { %v577_v1 = vld [vmem:[%s2602_s1 + $0xf8] sm:$0xff]  ;;  %594 = vmatpush.msra.mxu0 %v561_v0  ;;  %v576_v3 = vld [vmem:[%s2602_s1 + $0xf0] sm:$0xff]  ;;  %v575_v5 = vld [vmem:[%s2602_s1 + $0xe8] sm:$0xff]  ;;  %s1806_s18 = sshll.u32 %s2619_s29, 4 }
   0xe   : > { %659 = vmatpush.msra.mxu1 %v577_v1  ;;  %v558_v6 = vld [vmem:[%s2602_s1 + $0x60] sm:$0xff]  ;;  %v557_v8 = vld [vmem:[%s2602_s1 + $0x58] sm:$0xff]  ;;  %v556_v10 = vld [vmem:[%s2602_s1 + $0x50] sm:$0xff]  ;;  %s2105_s15 = scalar_lea.vmem %s2601_s0, %s1806_s18  ;;  %s2253_s18 = sshll.u32 %s2619_s29, 3 }
   0xf   : > { %595 = vmatpush.msra.mxu0 %v560_v2  ;;  %v574_v7 = vld [vmem:[%s2602_s1 + $0xe0] sm:$0xff]  ;;  %v573_v9 = vld [vmem:[%s2602_s1 + $0xd8] sm:$0xff]  ;;  %v572_v11 = vld [vmem:[%s2602_s1 + $0xd0] sm:$0xff]  ;;  %s2271_s17 = scalar_lea.vmem %s2604_s3, %s2253_s18  ;;  %s2292_s29 = scalar_lea.vmem %s2603_s2, %s2253_s18 }
  0x10   : > { %660 = vmatpush.msra.mxu1 %v576_v3  ;;  %v555_v12 = vld [vmem:[%s2602_s1 + $0x48] sm:$0xff]  ;;  %v554_v14 = vld [vmem:[%s2602_s1 + $0x40] sm:$0xff]  ;;  %v553_v16 = vld [vmem:[%s2602_s1 + $0x38] sm:$0xff]  ;;  %s2561_s14 = scalar_lea.vmem %s2613_s12, %s2253_s18 }
  0x11   : > { %596 = vmatpush.msra.mxu0 %v559_v4  ;;  %v571_v13 = vld [vmem:[%s2602_s1 + $0xc8] sm:$0xff]  ;;  %v570_v15 = vld [vmem:[%s2602_s1 + $0xc0] sm:$0xff]  ;;  %v569_v17 = vld [vmem:[%s2602_s1 + $0xb8] sm:$0xff] }
  0x12   : > { %661 = vmatpush.msra.mxu1 %v575_v5  ;;  %v552_v18 = vld [vmem:[%s2602_s1 + $0x30] sm:$0xff]  ;;  %v551_v20 = vld [vmem:[%s2602_s1 + $0x28] sm:$0xff]  ;;  %v550_v22 = vld [vmem:[%s2602_s1 + $0x20] sm:$0xff] }
  0x13   : > { %597 = vmatpush.msra.mxu0 %v558_v6  ;;  %v568_v19 = vld [vmem:[%s2602_s1 + $0xb0] sm:$0xff]  ;;  %v567_v21 = vld [vmem:[%s2602_s1 + $0xa8] sm:$0xff]  ;;  %v566_v23 = vld [vmem:[%s2602_s1 + $0xa0] sm:$0xff] }
  0x14   : > { %662 = vmatpush.msra.mxu1 %v574_v7  ;;  %v549_v24 = vld [vmem:[%s2602_s1 + $0x18] sm:$0xff]  ;;  %v548_v26 = vld [vmem:[%s2602_s1 + $0x10] sm:$0xff]  ;;  %v547_v28 = vld [vmem:[%s2602_s1 + $0x8] sm:$0xff] }
  0x15   : > { %598 = vmatpush.msra.mxu0 %v557_v8  ;;  %v565_v25 = vld [vmem:[%s2602_s1 + $0x98] sm:$0xff]  ;;  %v564_v27 = vld [vmem:[%s2602_s1 + $0x90] sm:$0xff]  ;;  %v563_v29 = vld [vmem:[%s2602_s1 + $0x88] sm:$0xff] }
  0x16   : > { %663 = vmatpush.msra.mxu1 %v573_v9  ;;  %v546_v30 = vld [vmem:[%s2602_s1] sm:$0xff]  ;;  %v513_v33 = vld [vmem:[%s2105_s15 + $0x8] sm:$0xff]  ;;  %v1024_v34 = vld [vmem:[%s2609_s8 + $0x78] sm:$0xff] }
  0x17   : > { %599 = vmatpush.msra.mxu0 %v556_v10  ;;  %v562_v31 = vld [vmem:[%s2602_s1 + $0x80] sm:$0xff]  ;;  %v1023_v35 = vld [vmem:[%s2609_s8 + $0x70] sm:$0xff]  ;;  %v1022_v36 = vld [vmem:[%s2609_s8 + $0x68] sm:$0xff] }
  0x18   : > { %664 = vmatpush.msra.mxu1 %v572_v11  ;;  %v512_v32 = vld [vmem:[%s2105_s15] sm:$0xff]  ;;  %v514_v38 = vld [vmem:[%s2105_s15 + $0x10] sm:$0xff]  ;;  %v515_v39 = vld [vmem:[%s2105_s15 + $0x18] sm:$0xff] }
  0x19   : > { %600 = vmatpush.msra.mxu0 %v555_v12  ;;  %v1021_v37 = vld [vmem:[%s2609_s8 + $0x60] sm:$0xff]  ;;  %v1020_v40 = vld [vmem:[%s2609_s8 + $0x58] sm:$0xff]  ;;  %v1019_v41 = vld [vmem:[%s2609_s8 + $0x50] sm:$0xff] }
  0x1a   : > { %665 = vmatpush.msra.mxu1 %v571_v13  ;;  %v516_v42 = vld [vmem:[%s2105_s15 + $0x20] sm:$0xff]  ;;  %v517_v43 = vld [vmem:[%s2105_s15 + $0x28] sm:$0xff]  ;;  %v518_v45 = vld [vmem:[%s2105_s15 + $0x30] sm:$0xff] }
  0x1b   : > { %601 = vmatpush.msra.mxu0 %v554_v14  ;;  %v1018_v44 = vld [vmem:[%s2609_s8 + $0x48] sm:$0xff]  ;;  %v519_v46 = vld [vmem:[%s2105_s15 + $0x38] sm:$0xff]  ;;  %v1017_v47 = vld [vmem:[%s2609_s8 + $0x40] sm:$0xff] }
  0x1c   : > { %666 = vmatpush.msra.mxu1 %v570_v15  ;;  %v520_v48 = vld [vmem:[%s2105_s15 + $0x40] sm:$0xff]  ;;  %v521_v49 = vld [vmem:[%s2105_s15 + $0x48] sm:$0xff]  ;;  %v1016_v50 = vld [vmem:[%s2609_s8 + $0x38] sm:$0xff] }
  0x1d   : > { %602 = vmatpush.msra.mxu0 %v553_v16  ;;  %v522_v51 = vld [vmem:[%s2105_s15 + $0x50] sm:$0xff]  ;;  %v523_v52 = vld [vmem:[%s2105_s15 + $0x58] sm:$0xff]  ;;  %v524_v54 = vld [vmem:[%s2105_s15 + $0x60] sm:$0xff] }
  0x1e   : > { %667 = vmatpush.msra.mxu1 %v569_v17  ;;  %v1015_v53 = vld [vmem:[%s2609_s8 + $0x30] sm:$0xff]  ;;  %v525_v55 = vld [vmem:[%s2105_s15 + $0x68] sm:$0xff]  ;;  %v527_v58 = vld [vmem:[%s2105_s15 + $0x78] sm:$0xff] }
  0x1f   : > { %603 = vmatpush.msra.mxu0 %v552_v18  ;;  %v1014_v56 = vld [vmem:[%s2609_s8 + $0x28] sm:$0xff]  ;;  %v526_v57 = vld [vmem:[%s2105_s15 + $0x70] sm:$0xff]  ;;  %v1013_v59 = vld [vmem:[%s2609_s8 + $0x20] sm:$0xff] }
  0x20   : > { %668 = vmatpush.msra.mxu1 %v568_v19  ;;  %v923_v60 = vld [vmem:[%s2607_s6 + $0x78] sm:$0xff]  ;;  %v922_v61 = vld [vmem:[%s2607_s6 + $0x70] sm:$0xff]  ;;  %v921_v0 = vld [vmem:[%s2607_s6 + $0x68] sm:$0xff] }
  0x21   : > { %604 = vmatpush.msra.mxu0 %v551_v20  ;;  %928 = vmatpush.msra.mxu3 %v923_v60  ;;  %v806_v62 = vld [vmem:[%s2605_s4 + $0x78] sm:$0xff]  ;;  %v805_v63 = vld [vmem:[%s2605_s4 + $0x70] sm:$0xff]  ;;  %v920_v1 = vld [vmem:[%s2607_s6 + $0x60] sm:$0xff] }
  0x22   : > { %669 = vmatpush.msra.mxu1 %v567_v21  ;;  %811 = vmatpush.msra.mxu2 %v806_v62  ;;  %v528_v2 = vld [vmem:[%s2105_s15 + $0x80] sm:$0xff]  ;;  %v529_v3 = vld [vmem:[%s2105_s15 + $0x88] sm:$0xff]  ;;  %v1012_v4 = vld [vmem:[%s2609_s8 + $0x18] sm:$0xff] }
  0x23   : > { %605 = vmatpush.msra.mxu0 %v550_v22  ;;  %929 = vmatpush.msra.mxu3 %v922_v61  ;;  %v804_v5 = vld [vmem:[%s2605_s4 + $0x68] sm:$0xff]  ;;  %v919_v6 = vld [vmem:[%s2607_s6 + $0x58] sm:$0xff]  ;;  %v803_v7 = vld [vmem:[%s2605_s4 + $0x60] sm:$0xff] }
  0x24   : > { %670 = vmatpush.msra.mxu1 %v566_v23  ;;  %812 = vmatpush.msra.mxu2 %v805_v63  ;;  %v918_v8 = vld [vmem:[%s2607_s6 + $0x50] sm:$0xff]  ;;  %v802_v9 = vld [vmem:[%s2605_s4 + $0x58] sm:$0xff]  ;;  %v917_v10 = vld [vmem:[%s2607_s6 + $0x48] sm:$0xff] }
  0x25   : > { %606 = vmatpush.msra.mxu0 %v549_v24  ;;  %930 = vmatpush.msra.mxu3 %v921_v0  ;;  %v801_v11 = vld [vmem:[%s2605_s4 + $0x50] sm:$0xff]  ;;  %v531_v13 = vld [vmem:[%s2105_s15 + $0x98] sm:$0xff]  ;;  %v916_v14 = vld [vmem:[%s2607_s6 + $0x40] sm:$0xff] }
  0x26   : > { %671 = vmatpush.msra.mxu1 %v565_v25  ;;  %813 = vmatpush.msra.mxu2 %v804_v5  ;;  %v530_v12 = vld [vmem:[%s2105_s15 + $0x90] sm:$0xff]  ;;  %v800_v16 = vld [vmem:[%s2605_s4 + $0x48] sm:$0xff]  ;;  %v915_v17 = vld [vmem:[%s2607_s6 + $0x38] sm:$0xff] }
  0x27   : > { %607 = vmatpush.msra.mxu0 %v548_v26  ;;  %931 = vmatpush.msra.mxu3 %v920_v1  ;;  %v1011_v15 = vld [vmem:[%s2609_s8 + $0x10] sm:$0xff]  ;;  %v799_v18 = vld [vmem:[%s2605_s4 + $0x40] sm:$0xff]  ;;  %v798_v20 = vld [vmem:[%s2605_s4 + $0x38] sm:$0xff] }
  0x28   : > { %672 = vmatpush.msra.mxu1 %v564_v27  ;;  %814 = vmatpush.msra.mxu2 %v803_v7  ;;  %v914_v19 = vld [vmem:[%s2607_s6 + $0x30] sm:$0xff]  ;;  %v913_v21 = vld [vmem:[%s2607_s6 + $0x28] sm:$0xff]  ;;  %v532_v22 = vld [vmem:[%s2105_s15 + $0xa0] sm:$0xff] }
  0x29   : > { %608 = vmatpush.msra.mxu0 %v547_v28  ;;  %932 = vmatpush.msra.mxu3 %v919_v6  ;;  %v533_v23 = vld [vmem:[%s2105_s15 + $0xa8] sm:$0xff]  ;;  %v797_v24 = vld [vmem:[%s2605_s4 + $0x30] sm:$0xff]  ;;  %v912_v25 = vld [vmem:[%s2607_s6 + $0x20] sm:$0xff] }
  0x2a   : > { %673 = vmatpush.msra.mxu1 %v563_v29  ;;  %815 = vmatpush.msra.mxu2 %v802_v9  ;;  %v1010_v26 = vld [vmem:[%s2609_s8 + $0x8] sm:$0xff]  ;;  %v911_v28 = vld [vmem:[%s2607_s6 + $0x18] sm:$0xff]  ;;  %v795_v29 = vld [vmem:[%s2605_s4 + $0x20] sm:$0xff] }
  0x2b   : > { %609 = vmatpush.msra.mxu0 %v546_v30  ;;  %933 = vmatpush.msra.mxu3 %v918_v8  ;;  %v796_v27 = vld [vmem:[%s2605_s4 + $0x28] sm:$0xff]  ;;  %v910_v30 = vld [vmem:[%s2607_s6 + $0x10] sm:$0xff]  ;;  %v778_v62 = vld [vmem:[%s2292_s29 + $0x18] sm:$0xff] }
  0x2c   : > { %674 = vmatpush.msra.mxu1 %v562_v31  ;;  %610 = vmatmul.f32.vlgmr.msra.gmra.mxu0 %v512_v32  ;;  %v794_v31 = vld [vmem:[%s2605_s4 + $0x18] sm:$0xff]  ;;  %v909_v32 = vld [vmem:[%s2607_s6 + $0x8] sm:$0xff]  ;;  %v542_v63 = vld [vmem:[%s2105_s15 + $0xf0] sm:$0xff] }
  0x2d   : > { %675 = vmatmul.f32.vlgmr.msra.gmra.mxu1 %v513_v33  ;;  %1029 = vmatpush.msrb.mxu0 %v1024_v34  ;;  %v534_v33 = vld [vmem:[%s2105_s15 + $0xb0] sm:$0xff]  ;;  %v535_v34 = vld [vmem:[%s2105_s15 + $0xb8] sm:$0xff]  ;;  %v1155_v60 = vld [vmem:[%s2611_s10 + $0x168] sm:$0xff] }
  0x2e   : > { %934 = vmatpush.msra.mxu3 %v917_v10  ;;  %816 = vmatpush.msra.mxu2 %v801_v11  ;;  %v1123_v61 = vld [vmem:[%s2611_s10 + $0x68] sm:$0xff]  ;;  %v543_v0 = vld [vmem:[%s2105_s15 + $0xf8] sm:$0xff]  ;;  %v896_v1 = vld [vmem:[%s2271_s17 + $0x20] sm:$0xff] }
  0x2f   : > { %1030 = vmatpush.msrb.mxu0 %v1023_v35  ;;  %v793_v35 = vld [vmem:[%s2605_s4 + $0x10] sm:$0xff]  ;;  %v779_v5 = vld [vmem:[%s2292_s29 + $0x20] sm:$0xff]  ;;  %v897_v9 = vld [vmem:[%s2271_s17 + $0x28] sm:$0xff] }
  0x30   : > { %935 = vmatpush.msra.mxu3 %v916_v14  ;;  %817 = vmatpush.msra.mxu2 %v800_v16  ;;  %v1137_v10 = vld [vmem:[%s2611_s10 + $0xd8] sm:$0xff] }
  0x31   : > { %1031 = vmatpush.msrb.mxu0 %v1022_v36  ;;  %v908_v36 = vld [vmem:[%s2607_s6] sm:$0xff]  ;;  %v1153_v11 = vld [vmem:[%s2611_s10 + $0x158] sm:$0xff] }
  0x32   : > { %936 = vmatpush.msra.mxu3 %v915_v17  ;;  %818 = vmatpush.msra.mxu2 %v799_v18  ;;  %v898_v17 = vld [vmem:[%s2271_s17 + $0x30] sm:$0xff] }
  0x33   : > { %1032 = vmatpush.msrb.mxu0 %v1021_v37  ;;  %v892_v37 = vld [vmem:[%s2271_s17] sm:$0xff]  ;;  %v1136_v18 = vld [vmem:[%s2611_s10 + $0xd0] sm:$0xff] }
  0x34   : > { %613 = vmatmul.f32.gmra.mxu0 %v514_v38  ;;  %937 = vmatpush.msra.mxu3 %v914_v19  ;;  %v1009_v38 = vld [vmem:[%s2609_s8] sm:$0xff]  ;;  %v1152_v19 = vld [vmem:[%s2611_s10 + $0x150] sm:$0xff] }
  0x35   : > { %678 = vmatmul.f32.gmra.mxu1 %v515_v39  ;;  %1033 = vmatpush.msrb.mxu0 %v1020_v40  ;;  %v792_v39 = vld [vmem:[%s2605_s4 + $0x8] sm:$0xff]  ;;  %v791_v40 = vld [vmem:[%s2605_s4] sm:$0xff] }
  0x36   : > { %819 = vmatpush.msra.mxu2 %v798_v20  ;;  %938 = vmatpush.msra.mxu3 %v913_v21  ;;  %v1120_v20 = vld [vmem:[%s2611_s10 + $0x50] sm:$0xff] }
  0x37   : > { %1034 = vmatpush.msrb.mxu0 %v1019_v41  ;;  %v775_v41 = vld [vmem:[%s2292_s29] sm:$0xff]  ;;  %v781_v21 = vld [vmem:[%s2292_s29 + $0x30] sm:$0xff] }
  0x38   : > { %820 = vmatpush.msra.mxu2 %v797_v24  ;;  %939 = vmatpush.msra.mxu3 %v912_v25  ;;  %v899_v25 = vld [vmem:[%s2271_s17 + $0x38] sm:$0xff] }
  0x39   : > { %1035 = vmatpush.msrb.mxu0 %v1018_v44  ;;  %v893_v44 = vld [vmem:[%s2271_s17 + $0x8] sm:$0xff] }
  0x3a   : > { %821 = vmatpush.msra.mxu2 %v796_v27  ;;  %940 = vmatpush.msra.mxu3 %v911_v28  ;;  %v1151_v27 = vld [vmem:[%s2611_s10 + $0x148] sm:$0xff] }
  0x3b   : > { %1036 = vmatpush.msrb.mxu0 %v1017_v47  ;;  %v1125_v47 = vld [vmem:[%s2611_s10 + $0x78] sm:$0xff]  ;;  %v1119_v28 = vld [vmem:[%s2611_s10 + $0x48] sm:$0xff] }
  0x3c   : > { %616 = vmatmul.f32.gmra.mxu0 %v516_v42  ;;  %822 = vmatpush.msra.mxu2 %v795_v29  ;;  %v536_v42 = vld [vmem:[%s2105_s15 + $0xc0] sm:$0xff]  ;;  %v782_v29 = vld [vmem:[%s2292_s29 + $0x38] sm:$0xff] }
  0x3d   : > { %681 = vmatmul.f32.gmra.mxu1 %v517_v43  ;;  %1037 = vmatpush.msrb.mxu0 %v1016_v50  ;;  %v537_v43 = vld [vmem:[%s2105_s15 + $0xc8] sm:$0xff]  ;;  %v539_v50 = vld [vmem:[%s2105_s15 + $0xd8] sm:$0xff] }
  0x3e   : > { %941 = vmatpush.msra.mxu3 %v910_v30  ;;  %823 = vmatpush.msra.mxu2 %v794_v31 }
  0x3f   : > { %1038 = vmatpush.msrb.mxu0 %v1015_v53  ;;  %1162 = vmatpush.msrb.mxu1 %v1125_v47  ;;  %v1156_v53 = vld [vmem:[%s2611_s10 + $0x170] sm:$0xff] }
  0x40   : > { %942 = vmatpush.msra.mxu3 %v909_v32  ;;  %824 = vmatpush.msra.mxu2 %v793_v35  ;;  %v1150_v35 = vld [vmem:[%s2611_s10 + $0x140] sm:$0xff] }
  0x41   : > { %1039 = vmatpush.msrb.mxu0 %v1014_v56  ;;  %v540_v56 = vld [vmem:[%s2105_s15 + $0xe0] sm:$0xff] }
  0x42   : > { %943 = vmatpush.msra.mxu3 %v908_v36  ;;  %825 = vmatpush.msra.mxu2 %v792_v39  ;;  %v1118_v36 = vld [vmem:[%s2611_s10 + $0x40] sm:$0xff] }
  0x43   : > { %1040 = vmatpush.msrb.mxu0 %v1013_v59  ;;  %944 = vmatmul.f32.vlgmr.msra.gmra.mxu3 %v892_v37  ;;  %v1139_v59 = vld [vmem:[%s2611_s10 + $0xe8] sm:$0xff]  ;;  %v783_v37 = vld [vmem:[%s2292_s29 + $0x40] sm:$0xff] }
  0x44   : > { %619 = vmatmul.f32.gmra.mxu0 %v518_v45  ;;  %826 = vmatpush.msra.mxu2 %v791_v40  ;;  %v1141_v45 = vld [vmem:[%s2611_s10 + $0xf8] sm:$0xff] }
  0x45   : > { %684 = vmatmul.f32.gmra.mxu1 %v519_v46  ;;  %1041 = vmatpush.msrb.mxu0 %v1012_v4  ;;  %v1157_v46 = vld [vmem:[%s2611_s10 + $0x178] sm:$0xff]  ;;  %v1122_v4 = vld [vmem:[%s2611_s10 + $0x60] sm:$0xff] }
  0x46   : > { %827 = vmatmul.f32.vlgmr.msra.gmra.mxu2 %v775_v41  ;;  %1292 = vmatpush.msrb.mxu3 %v1157_v46  ;;  %v901_v41 = vld [vmem:[%s2271_s17 + $0x48] sm:$0xff] }
  0x47   : > { %1042 = vmatpush.msrb.mxu0 %v1011_v15  ;;  %1227 = vmatpush.msrb.mxu2 %v1141_v45  ;;  %v784_v45 = vld [vmem:[%s2292_s29 + $0x48] sm:$0xff] }
  0x48   : > { %1293 = vmatpush.msrb.mxu3 %v1156_v53  ;;  %v785_v53 = vld [vmem:[%s2292_s29 + $0x50] sm:$0xff] }
  0x49   : > { %1043 = vmatpush.msrb.mxu0 %v1010_v26  ;;  %v1135_v26 = vld [vmem:[%s2611_s10 + $0xc8] sm:$0xff] }
  0x4a   : > { %1294 = vmatpush.msrb.mxu3 %v1155_v60  ;;  %v1115_v60 = vld [vmem:[%s2611_s10 + $0x28] sm:$0xff] }
  0x4b   : > { %1044 = vmatpush.msrb.mxu0 %v1009_v38  ;;  %947 = vmatmul.f32.gmra.mxu3 %v893_v44  ;;  %v1117_v44 = vld [vmem:[%s2611_s10 + $0x38] sm:$0xff] }
  0x4c   : > { %622 = vmatmul.f32.gmra.mxu0 %v520_v48  ;;  %v776_v48 = vld [vmem:[%s2292_s29 + $0x8] sm:$0xff] }
  0x4d   : > { %687 = vmatmul.f32.gmra.mxu1 %v521_v49  ;;  %v538_v49 = vld [vmem:[%s2105_s15 + $0xd0] sm:$0xff] }
  0x4e   : > { %830 = vmatmul.f32.gmra.mxu2 %v776_v48 }
  0x54   : > { %625 = vmatmul.f32.gmra.mxu0 %v522_v51  ;;  %v894_v51 = vld [vmem:[%s2271_s17 + $0x10] sm:$0xff] }
  0x55   : > { %690 = vmatmul.f32.gmra.mxu1 %v523_v52  ;;  %v1140_v52 = vld [vmem:[%s2611_s10 + $0xf0] sm:$0xff]  ;;  %950 = vmatmul.f32.gmra.mxu3 %v894_v51 }
  0x56   : > { %1228 = vmatpush.msrb.mxu2 %v1140_v52  ;;  %v1148_v51 = vld [vmem:[%s2611_s10 + $0x130] sm:$0xff] }
  0x57   : > { %v1116_v52 = vld [vmem:[%s2611_s10 + $0x30] sm:$0xff] }
  0x58   : > { %1229 = vmatpush.msrb.mxu2 %v1139_v59  ;;  %v1147_v59 = vld [vmem:[%s2611_s10 + $0x128] sm:$0xff] }
  0x5c   : > { %628 = vmatmul.f32.gmra.mxu0 %v524_v54  ;;  %v1124_v54 = vld [vmem:[%s2611_s10 + $0x70] sm:$0xff] }
  0x5d   : > { %693 = vmatmul.f32.gmra.mxu1 %v525_v55  ;;  %v777_v55 = vld [vmem:[%s2292_s29 + $0x10] sm:$0xff] }
  0x5e   : > { %1163 = vmatpush.msrb.mxu1 %v1124_v54  ;;  %833 = vmatmul.f32.gmra.mxu2 %v777_v55 }
  0x60   : > { %1164 = vmatpush.msrb.mxu1 %v1123_v61  ;;  %v786_v61 = vld [vmem:[%s2292_s29 + $0x58] sm:$0xff] }
  0x62   : > { %1165 = vmatpush.msrb.mxu1 %v1122_v4  ;;  %v1114_v4 = vld [vmem:[%s2611_s10 + $0x20] sm:$0xff] }
  0x64   : > { %631 = vmatmul.f32.gmra.mxu0 %v526_v57  ;;  %v541_v57 = vld [vmem:[%s2105_s15 + $0xe8] sm:$0xff] }
  0x65   : > { %696 = vmatmul.f32.gmra.mxu1 %v527_v58  ;;  %v895_v58 = vld [vmem:[%s2271_s17 + $0x18] sm:$0xff] }
  0x66   : > { %953 = vmatmul.f32.gmra.mxu3 %v895_v58  ;;  %836 = vmatmul.f32.gmra.mxu2 %v778_v62  ;;  %v1131_v58 = vld [vmem:[%s2611_s10 + $0xa8] sm:$0xff] }
  0x6c   : > { %634 = vmatmul.f32.gmra.mxu0 %v528_v2  ;;  %v1138_v2 = vld [vmem:[%s2611_s10 + $0xe0] sm:$0xff] }
  0x6d   : > { %699 = vmatmul.f32.gmra.mxu1 %v529_v3  ;;  %v1154_v3 = vld [vmem:[%s2611_s10 + $0x160] sm:$0xff]  ;;  %1230 = vmatpush.msrb.mxu2 %v1138_v2 }
  0x6e   : > { %1295 = vmatpush.msrb.mxu3 %v1154_v3  ;;  %839 = vmatmul.f32.gmra.mxu2 %v779_v5  ;;  %v1130_v2 = vld [vmem:[%s2611_s10 + $0xa0] sm:$0xff] }
  0x6f   : > { %956 = vmatmul.f32.gmra.mxu3 %v896_v1  ;;  %1231 = vmatpush.msrb.mxu2 %v1137_v10  ;;  %v904_v1 = vld [vmem:[%s2271_s17 + $0x60] sm:$0xff]  ;;  %v1129_v10 = vld [vmem:[%s2611_s10 + $0x98] sm:$0xff] }
  0x70   : > { %1296 = vmatpush.msrb.mxu3 %v1153_v11  ;;  %v1146_v3 = vld [vmem:[%s2611_s10 + $0x120] sm:$0xff]  ;;  %v1145_v11 = vld [vmem:[%s2611_s10 + $0x118] sm:$0xff] }
  0x71   : > { %1232 = vmatpush.msrb.mxu2 %v1136_v18  ;;  %v787_v5 = vld [vmem:[%s2292_s29 + $0x60] sm:$0xff]  ;;  %v1128_v18 = vld [vmem:[%s2611_s10 + $0x90] sm:$0xff] }
  0x72   : > { %1297 = vmatpush.msrb.mxu3 %v1152_v19  ;;  %v1144_v19 = vld [vmem:[%s2611_s10 + $0x110] sm:$0xff] }
  0x73   : > { %1233 = vmatpush.msrb.mxu2 %v1135_v26  ;;  %v1127_v26 = vld [vmem:[%s2611_s10 + $0x88] sm:$0xff] }
  0x74   : > { %637 = vmatmul.f32.gmra.mxu0 %v530_v12  ;;  %v1121_v12 = vld [vmem:[%s2611_s10 + $0x58] sm:$0xff]  ;;  %1298 = vmatpush.msrb.mxu3 %v1151_v27  ;;  %v1143_v27 = vld [vmem:[%s2611_s10 + $0x108] sm:$0xff] }
  0x75   : > { %702 = vmatmul.f32.gmra.mxu1 %v531_v13  ;;  %v780_v13 = vld [vmem:[%s2292_s29 + $0x28] sm:$0xff] }
  0x76   : > { %1166 = vmatpush.msrb.mxu1 %v1121_v12  ;;  %842 = vmatmul.f32.gmra.mxu2 %v780_v13  ;;  %v1113_v12 = vld [vmem:[%s2611_s10 + $0x18] sm:$0xff]  ;;  %v788_v13 = vld [vmem:[%s2292_s29 + $0x68] sm:$0xff] }
  0x77   : > { %959 = vmatmul.f32.gmra.mxu3 %v897_v9  ;;  %v905_v9 = vld [vmem:[%s2271_s17 + $0x68] sm:$0xff] }
  0x78   : > { %1167 = vmatpush.msrb.mxu1 %v1120_v20  ;;  %1299 = vmatpush.msrb.mxu3 %v1150_v35  ;;  %v1112_v20 = vld [vmem:[%s2611_s10 + $0x10] sm:$0xff]  ;;  %v1110_v35 = vld [vmem:[%s2611_s10] sm:$0xff] }
  0x7a   : > { %1168 = vmatpush.msrb.mxu1 %v1119_v28  ;;  %v1111_v28 = vld [vmem:[%s2611_s10 + $0x8] sm:$0xff] }
  0x7c   : > { %640 = vmatmul.f32.gmra.mxu0 %v532_v22  ;;  %1169 = vmatpush.msrb.mxu1 %v1118_v36  ;;  %v2483_v36 = vld [vmem:[%s2608_s7] ss:$0 sm:$0xff] }
  0x7d   : > { %705 = vmatmul.f32.gmra.mxu1 %v533_v23 }
  0x7e   : > { %845 = vmatmul.f32.gmra.mxu2 %v781_v21  ;;  %1170 = vmatpush.msrb.mxu1 %v1117_v44  ;;  %v789_v21 = vld [vmem:[%s2292_s29 + $0x70] sm:$0xff] }
  0x7f   : > { %962 = vmatmul.f32.gmra.mxu3 %v898_v17  ;;  %v906_v17 = vld [vmem:[%s2271_s17 + $0x70] sm:$0xff] }
  0x80   : > { %1171 = vmatpush.msrb.mxu1 %v1116_v52 }
  0x82   : > { %1172 = vmatpush.msrb.mxu1 %v1115_v60 }
  0x84   : > { %643 = vmatmul.f32.gmra.mxu0 %v534_v33  ;;  %v900_v33 = vld [vmem:[%s2271_s17 + $0x40] sm:$0xff]  ;;  %1173 = vmatpush.msrb.mxu1 %v1114_v4 }
  0x85   : > { %708 = vmatmul.f32.gmra.mxu1 %v535_v34  ;;  %v1134_v34 = vld [vmem:[%s2611_s10 + $0xc0] sm:$0xff] }
  0x86   : > { %848 = vmatmul.f32.gmra.mxu2 %v782_v29  ;;  %1174 = vmatpush.msrb.mxu1 %v1113_v12  ;;  %v790_v29 = vld [vmem:[%s2292_s29 + $0x78] sm:$0xff] }
  0x87   : > { %965 = vmatmul.f32.gmra.mxu3 %v899_v25  ;;  %1234 = vmatpush.msrb.mxu2 %v1134_v34  ;;  %v907_v25 = vld [vmem:[%s2271_s17 + $0x78] sm:$0xff]  ;;  %v1142_v34 = vld [vmem:[%s2611_s10 + $0x100] sm:$0xff] }
  0x88   : > { %1175 = vmatpush.msrb.mxu1 %v1112_v20 }
  0x8a   : > { %1176 = vmatpush.msrb.mxu1 %v1111_v28 }
  0x8c   : > { %646 = vmatmul.f32.gmra.mxu0 %v536_v42  ;;  %v1133_v42 = vld [vmem:[%s2611_s10 + $0xb8] sm:$0xff]  ;;  %1177 = vmatpush.msrb.mxu1 %v1110_v35 }
  0x8d   : > { %711 = vmatmul.f32.gmra.mxu1 %v537_v43  ;;  %v1149_v43 = vld [vmem:[%s2611_s10 + $0x138] sm:$0xff]  ;;  %1235 = vmatpush.msrb.mxu2 %v1133_v42 }
  0x8e   : > { %851 = vmatmul.f32.gmra.mxu2 %v783_v37  ;;  %1300 = vmatpush.msrb.mxu3 %v1149_v43 }
  0x8f   : > { %968 = vmatmul.f32.gmra.mxu3 %v900_v33  ;;  %v1126_v33 = vld [vmem:[%s2611_s10 + $0x80] sm:$0xff] }
  0x90   : > { %1301 = vmatpush.msrb.mxu3 %v1148_v51 }
  0x92   : > { %1302 = vmatpush.msrb.mxu3 %v1147_v59 }
  0x94   : > { %649 = vmatmul.f32.gmra.mxu0 %v538_v49  ;;  %v902_v49 = vld [vmem:[%s2271_s17 + $0x50] sm:$0xff]  ;;  %1303 = vmatpush.msrb.mxu3 %v1146_v3 }
  0x95   : > { %714 = vmatmul.f32.gmra.mxu1 %v539_v50  ;;  %v1132_v50 = vld [vmem:[%s2611_s10 + $0xb0] sm:$0xff] }
  0x96   : > { %854 = vmatmul.f32.gmra.mxu2 %v784_v45  ;;  %1304 = vmatpush.msrb.mxu3 %v1145_v11 }
  0x97   : > { %971 = vmatmul.f32.gmra.mxu3 %v901_v41  ;;  %1236 = vmatpush.msrb.mxu2 %v1132_v50  ;;  %v2488_v41 = vld [vmem:[%s2606_s5] ss:$0 sm:$0xff] }
  0x98   : > { %1305 = vmatpush.msrb.mxu3 %v1144_v19 }
  0x99   : > { %1237 = vmatpush.msrb.mxu2 %v1131_v58 }
  0x9a   : > { %1306 = vmatpush.msrb.mxu3 %v1143_v27 }
  0x9b   : > { %1238 = vmatpush.msrb.mxu2 %v1130_v2 }
  0x9c   : > { %652 = vmatmul.f32.gmra.mxu0 %v540_v56  ;;  %1307 = vmatpush.msrb.mxu3 %v1142_v34 }
  0x9d   : > { %717 = vmatmul.f32.gmra.mxu1 %v541_v57  ;;  %v903_v57 = vld [vmem:[%s2271_s17 + $0x58] sm:$0xff]  ;;  %1239 = vmatpush.msrb.mxu2 %v1129_v10 }
  0x9e   : > { %857 = vmatmul.f32.gmra.mxu2 %v785_v53 }
  0x9f   : > { %974 = vmatmul.f32.gmra.mxu3 %v902_v49  ;;  %1240 = vmatpush.msrb.mxu2 %v1128_v18 }
  0xa1   : > { %1241 = vmatpush.msrb.mxu2 %v1127_v26 }
  0xa3   : > { %1242 = vmatpush.msrb.mxu2 %v1126_v33 }
  0xa4   : > { %655 = vmatmul.f32.gmra.mxu0 %v542_v63 }
  0xa5   : > { %720 = vmatmul.f32.gmra.mxu1 %v543_v0 }
  0xa6   : > { %860 = vmatmul.f32.gmra.mxu2 %v786_v61 }
  0xa7   : > { %977 = vmatmul.f32.gmra.mxu3 %v903_v57 }
  0xa9   : > { %v611_v6 = vpop.f32.mrf.mxu0 }
  0xaa   : > { %v676_v7 = vpop.f32.mrf.mxu1 }
  0xab   : > { %v677_v8 = vadd.f32 %v676_v7, %v611_v6 }
  0xad   : > { %1045 = vmatmul.f32.vlgmr.msrb.gmra.mxu0 %v677_v8 }
  0xae   : > { %863 = vmatmul.f32.gmra.mxu2 %v787_v5 }
  0xaf   : > { %980 = vmatmul.f32.gmra.mxu3 %v904_v1 }
  0xb1   : > { %v614_v14 = vpop.f32.mrf.mxu0 }
  0xb2   : > { %v679_v15 = vpop.f32.mrf.mxu1 }
  0xb3   : > { %v680_v16 = vadd.f32 %v679_v15, %v614_v14 }
  0xb5   : > { %1048 = vmatmul.f32.gmra.mxu0 %v680_v16 }
  0xb6   : > { %866 = vmatmul.f32.gmra.mxu2 %v788_v13 }
  0xb7   : > { %983 = vmatmul.f32.gmra.mxu3 %v905_v9 }
  0xb9   : > { %v617_v22 = vpop.f32.mrf.mxu0 }
  0xba   : > { %v682_v23 = vpop.f32.mrf.mxu1 }
  0xbb   : > { %v683_v24 = vadd.f32 %v682_v23, %v617_v22 }
  0xbd   : > { %1051 = vmatmul.f32.gmra.mxu0 %v683_v24 }
  0xbe   : > { %869 = vmatmul.f32.gmra.mxu2 %v789_v21 }
  0xbf   : > { %986 = vmatmul.f32.gmra.mxu3 %v906_v17 }
  0xc1   : > { %v620_v30 = vpop.f32.mrf.mxu0 }
  0xc2   : > { %v685_v31 = vpop.f32.mrf.mxu1 }
  0xc3   : > { %v686_v32 = vadd.f32 %v685_v31, %v620_v30 }
  0xc5   : > { %1054 = vmatmul.f32.gmra.mxu0 %v686_v32 }
  0xc6   : > { %872 = vmatmul.f32.gmra.mxu2 %v790_v29 }
  0xc7   : > { %989 = vmatmul.f32.gmra.mxu3 %v907_v25 }
  0xc9   : > { %v623_v38 = vpop.f32.mrf.mxu0  ;;  %v828_v44 = vpop.f32.mrf.mxu2 }
  0xca   : > { %v688_v39 = vpop.f32.mrf.mxu1  ;;  %v829_v45 = vadd.f32 %v2488_v41, %v828_v44 }
  0xcb   : > { %v689_v40 = vadd.f32 %v688_v39, %v623_v38 }
  0xcd   : > { %1057 = vmatmul.f32.gmra.mxu0 %v689_v40  ;;  %v945_v40 = vpop.f32.mrf.mxu3 }
  0xce   : > { %v946_v42 = vadd.f32 %v2483_v36, %v945_v40 }
  0xd0   : > { %v993_v43 = vmax.f32 %v946_v42, 0.0 }
  0xd1   : > { %v626_v46 = vpop.f32.mrf.mxu0  ;;  %v831_v52 = vpop.f32.mrf.mxu2 }
  0xd2   : > { %v691_v47 = vpop.f32.mrf.mxu1  ;;  %1243 = vmatmul.f32.vlgmr.msrb.gmra.mxu2 %v993_v43 }
  0xd3   : > { %v692_v48 = vadd.f32 %v691_v47, %v626_v46  ;;  %v876_v46 = vmax.f32 %v829_v45, 0.0 }
  0xd5   : > { %1060 = vmatmul.f32.gmra.mxu0 %v692_v48  ;;  %v948_v50 = vpop.f32.mrf.mxu3  ;;  %1178 = vmatmul.f32.vlgmr.msrb.gmra.mxu1 %v876_v46 }
  0xd6   : > { %v949_v51 = vadd.f32 %v2483_v36, %v948_v50 }
  0xd8   : > { %v994_v53 = vmax.f32 %v949_v51, 0.0 }
  0xd9   : > { %v629_v54 = vpop.f32.mrf.mxu0 }
  0xda   : > { %v694_v55 = vpop.f32.mrf.mxu1  ;;  %1246 = vmatmul.f32.gmra.mxu2 %v994_v53 }
  0xdb   : > { %v695_v56 = vadd.f32 %v694_v55, %v629_v54  ;;  %v832_v54 = vadd.f32 %v2488_v41, %v831_v52 }
  0xdd   : > { %1063 = vmatmul.f32.gmra.mxu0 %v695_v56  ;;  %v877_v55 = vmax.f32 %v832_v54, 0.0  ;;  %v951_v59 = vpop.f32.mrf.mxu3 }
  0xde   : > { %v952_v60 = vadd.f32 %v2483_v36, %v951_v59 }
  0xdf   : > { %1181 = vmatmul.f32.gmra.mxu1 %v877_v55 }
  0xe1   : > { %v632_v62 = vpop.f32.mrf.mxu0  ;;  %v834_v61 = vpop.f32.mrf.mxu2 }
  0xe2   : > { %v697_v63 = vpop.f32.mrf.mxu1 }
  0xe3   : > { %v698_v0 = vadd.f32 %v697_v63, %v632_v62  ;;  %v995_v62 = vmax.f32 %v952_v60, 0.0  ;;  %v835_v63 = vadd.f32 %v2488_v41, %v834_v61 }
  0xe5   : > { %1066 = vmatmul.f32.gmra.mxu0 %v698_v0  ;;  %1249 = vmatmul.f32.gmra.mxu2 %v995_v62  ;;  %v878_v0 = vmax.f32 %v835_v63, 0.0 }
  0xe7   : > { %1184 = vmatmul.f32.gmra.mxu1 %v878_v0 }
  0xe9   : > { %v635_v6 = vpop.f32.mrf.mxu0  ;;  %v954_v4 = vpop.f32.mrf.mxu3 }
  0xea   : > { %v700_v7 = vpop.f32.mrf.mxu1  ;;  %v955_v5 = vadd.f32 %v2483_v36, %v954_v4 }
  0xeb   : > { %v701_v8 = vadd.f32 %v700_v7, %v635_v6  ;;  %v837_v6 = vpop.f32.mrf.mxu2 }
  0xec   : > { %v996_v7 = vmax.f32 %v955_v5, 0.0  ;;  %v838_v9 = vadd.f32 %v2488_v41, %v837_v6 }
  0xed   : > { %1069 = vmatmul.f32.gmra.mxu0 %v701_v8  ;;  %v2500_v8 = vld [vmem:[%s2610_s9] ss:$0 sm:$0xff] }
  0xee   : > { %1252 = vmatmul.f32.gmra.mxu2 %v996_v7  ;;  %v879_v10 = vmax.f32 %v838_v9, 0.0 }
  0xf0   : > { %1187 = vmatmul.f32.gmra.mxu1 %v879_v10 }
  0xf1   : > { %v638_v14 = vpop.f32.mrf.mxu0 }
  0xf2   : > { %v703_v15 = vpop.f32.mrf.mxu1  ;;  %v957_v13 = vpop.f32.mrf.mxu3 }
  0xf3   : > { %v704_v16 = vadd.f32 %v703_v15, %v638_v14  ;;  %v958_v14 = vadd.f32 %v2483_v36, %v957_v13 }
  0xf5   : > { %1072 = vmatmul.f32.gmra.mxu0 %v704_v16  ;;  %v840_v16 = vpop.f32.mrf.mxu2  ;;  %v997_v17 = vmax.f32 %v958_v14, 0.0 }
  0xf6   : > { %v841_v18 = vadd.f32 %v2488_v41, %v840_v16 }
  0xf7   : > { %1255 = vmatmul.f32.gmra.mxu2 %v997_v17 }
  0xf8   : > { %v880_v19 = vmax.f32 %v841_v18, 0.0 }
  0xf9   : > { %v641_v22 = vpop.f32.mrf.mxu0 }
  0xfa   : > { %v706_v23 = vpop.f32.mrf.mxu1  ;;  %1190 = vmatmul.f32.gmra.mxu1 %v880_v19 }
  0xfb   : > { %v707_v24 = vadd.f32 %v706_v23, %v641_v22  ;;  %v960_v22 = vpop.f32.mrf.mxu3 }
  0xfc   : > { %v961_v23 = vadd.f32 %v2483_v36, %v960_v22 }
  0xfd   : > { %1075 = vmatmul.f32.gmra.mxu0 %v707_v24  ;;  %v843_v25 = vpop.f32.mrf.mxu2 }
  0xfe   : > { %v998_v26 = vmax.f32 %v961_v23, 0.0  ;;  %v844_v27 = vadd.f32 %v2488_v41, %v843_v25 }
 0x100   : > { %1258 = vmatmul.f32.gmra.mxu2 %v998_v26  ;;  %v881_v28 = vmax.f32 %v844_v27, 0.0 }
 0x101   : > { %v644_v30 = vpop.f32.mrf.mxu0 }
 0x102   : > { %v709_v31 = vpop.f32.mrf.mxu1  ;;  %1193 = vmatmul.f32.gmra.mxu1 %v881_v28 }
 0x103   : > { %v710_v32 = vadd.f32 %v709_v31, %v644_v30  ;;  %v963_v31 = vpop.f32.mrf.mxu3 }
 0x105   : > { %1078 = vmatmul.f32.gmra.mxu0 %v710_v32  ;;  %v964_v32 = vadd.f32 %v2483_v36, %v963_v31  ;;  %v846_v34 = vpop.f32.mrf.mxu2 }
 0x107   : > { %v999_v35 = vmax.f32 %v964_v32, 0.0 }
 0x109   : > { %v647_v37 = vpop.f32.mrf.mxu0  ;;  %1261 = vmatmul.f32.gmra.mxu2 %v999_v35 }
 0x10a   : > { %v712_v38 = vpop.f32.mrf.mxu1 }
 0x10b   : > { %v713_v39 = vadd.f32 %v712_v38, %v647_v37  ;;  %v847_v37 = vadd.f32 %v2488_v41, %v846_v34  ;;  %v966_v42 = vpop.f32.mrf.mxu3 }
 0x10c   : > { %v967_v43 = vadd.f32 %v2483_v36, %v966_v42 }
 0x10d   : > { %1081 = vmatmul.f32.gmra.mxu0 %v713_v39  ;;  %v882_v38 = vmax.f32 %v847_v37, 0.0  ;;  %v849_v45 = vpop.f32.mrf.mxu2 }
 0x10e   : > { %v1000_v46 = vmax.f32 %v967_v43, 0.0 }
 0x10f   : > { %1196 = vmatmul.f32.gmra.mxu1 %v882_v38 }
 0x111   : > { %v650_v47 = vpop.f32.mrf.mxu0  ;;  %1264 = vmatmul.f32.gmra.mxu2 %v1000_v46 }
 0x112   : > { %v715_v48 = vpop.f32.mrf.mxu1 }
 0x113   : > { %v716_v49 = vadd.f32 %v715_v48, %v650_v47  ;;  %v850_v47 = vadd.f32 %v2488_v41, %v849_v45  ;;  %v969_v51 = vpop.f32.mrf.mxu3 }
 0x114   : > { %v970_v52 = vadd.f32 %v2483_v36, %v969_v51 }
 0x115   : > { %1084 = vmatmul.f32.gmra.mxu0 %v716_v49  ;;  %v883_v48 = vmax.f32 %v850_v47, 0.0  ;;  %v852_v55 = vpop.f32.mrf.mxu2 }
 0x116   : > { %v1001_v54 = vmax.f32 %v970_v52, 0.0 }
 0x117   : > { %1199 = vmatmul.f32.gmra.mxu1 %v883_v48 }
 0x119   : > { %v653_v56 = vpop.f32.mrf.mxu0  ;;  %1267 = vmatmul.f32.gmra.mxu2 %v1001_v54 }
 0x11a   : > { %v718_v57 = vpop.f32.mrf.mxu1 }
 0x11b   : > { %v719_v58 = vadd.f32 %v718_v57, %v653_v56  ;;  %v853_v56 = vadd.f32 %v2488_v41, %v852_v55  ;;  %v972_v60 = vpop.f32.mrf.mxu3 }
 0x11c   : > { %v973_v61 = vadd.f32 %v2483_v36, %v972_v60 }
 0x11d   : > { %1087 = vmatmul.f32.gmra.mxu0 %v719_v58  ;;  %v884_v57 = vmax.f32 %v853_v56, 0.0  ;;  %v855_v0 = vpop.f32.mrf.mxu2 }
 0x11e   : > { %v1002_v63 = vmax.f32 %v973_v61, 0.0 }
 0x11f   : > { %1202 = vmatmul.f32.gmra.mxu1 %v884_v57 }
 0x121   : > { %v656_v1 = vpop.f32.mrf.mxu0  ;;  %1270 = vmatmul.f32.gmra.mxu2 %v1002_v63 }
 0x122   : > { %v721_v2 = vpop.f32.mrf.mxu1 }
 0x123   : > { %v722_v3 = vadd.f32 %v721_v2, %v656_v1  ;;  %v856_v1 = vadd.f32 %v2488_v41, %v855_v0  ;;  %v975_v5 = vpop.f32.mrf.mxu3 }
 0x124   : > { %v976_v6 = vadd.f32 %v2483_v36, %v975_v5 }
 0x125   : > { %1090 = vmatmul.f32.gmra.mxu0 %v722_v3  ;;  %v885_v2 = vmax.f32 %v856_v1, 0.0  ;;  %v858_v10 = vpop.f32.mrf.mxu2 }
 0x126   : > { %v1003_v9 = vmax.f32 %v976_v6, 0.0 }
 0x127   : > { %1205 = vmatmul.f32.gmra.mxu1 %v885_v2 }
 0x129   : > { %1273 = vmatmul.f32.gmra.mxu2 %v1003_v9 }
 0x12a   : > { %v1046_v11 = vpop.f32.mrf.mxu0 }
 0x12b   : > { %v1047_v12 = vadd.f32 %v2500_v8, %v1046_v11  ;;  %v859_v11 = vadd.f32 %v2488_v41, %v858_v10 }
 0x12d   : > { %v1094_v15 = vmax.f32 %v1047_v12, 0.0  ;;  %v886_v12 = vmax.f32 %v859_v11, 0.0  ;;  %v861_v19 = vpop.f32.mrf.mxu2 }
 0x12f   : > { %1308 = vmatmul.f32.vlgmr.msrb.gmra.mxu3 %v1094_v15  ;;  %v978_v15 = vpop.f32.mrf.mxu3  ;;  %1208 = vmatmul.f32.gmra.mxu1 %v886_v12 }
 0x130   : > { %v979_v16 = vadd.f32 %v2483_v36, %v978_v15 }
 0x132   : > { %v1049_v20 = vpop.f32.mrf.mxu0  ;;  %v1004_v18 = vmax.f32 %v979_v16, 0.0 }
 0x133   : > { %v1050_v21 = vadd.f32 %v2500_v8, %v1049_v20  ;;  %v862_v20 = vadd.f32 %v2488_v41, %v861_v19 }
 0x134   : > { %1276 = vmatmul.f32.gmra.mxu2 %v1004_v18 }
 0x135   : > { %v1095_v24 = vmax.f32 %v1050_v21, 0.0  ;;  %v887_v21 = vmax.f32 %v862_v20, 0.0  ;;  %v864_v28 = vpop.f32.mrf.mxu2 }
 0x137   : > { %1311 = vmatmul.f32.gmra.mxu3 %v1095_v24  ;;  %v981_v24 = vpop.f32.mrf.mxu3  ;;  %1211 = vmatmul.f32.gmra.mxu1 %v887_v21 }
 0x138   : > { %v982_v25 = vadd.f32 %v2483_v36, %v981_v24 }
 0x13a   : > { %v1052_v29 = vpop.f32.mrf.mxu0  ;;  %v1005_v27 = vmax.f32 %v982_v25, 0.0 }
 0x13b   : > { %v1053_v30 = vadd.f32 %v2500_v8, %v1052_v29  ;;  %v865_v29 = vadd.f32 %v2488_v41, %v864_v28 }
 0x13c   : > { %1279 = vmatmul.f32.gmra.mxu2 %v1005_v27 }
 0x13d   : > { %v1096_v33 = vmax.f32 %v1053_v30, 0.0  ;;  %v888_v30 = vmax.f32 %v865_v29, 0.0  ;;  %v867_v38 = vpop.f32.mrf.mxu2 }
 0x13f   : > { %1314 = vmatmul.f32.gmra.mxu3 %v1096_v33  ;;  %v984_v33 = vpop.f32.mrf.mxu3  ;;  %1214 = vmatmul.f32.gmra.mxu1 %v888_v30 }
 0x140   : > { %v985_v34 = vadd.f32 %v2483_v36, %v984_v33 }
 0x142   : > { %v1055_v39 = vpop.f32.mrf.mxu0  ;;  %v1006_v37 = vmax.f32 %v985_v34, 0.0 }
 0x143   : > { %v1056_v40 = vadd.f32 %v2500_v8, %v1055_v39  ;;  %v868_v39 = vadd.f32 %v2488_v41, %v867_v38 }
 0x144   : > { %1282 = vmatmul.f32.gmra.mxu2 %v1006_v37 }
 0x145   : > { %v1097_v44 = vmax.f32 %v1056_v40, 0.0  ;;  %v889_v40 = vmax.f32 %v868_v39, 0.0  ;;  %v870_v48 = vpop.f32.mrf.mxu2 }
 0x147   : > { %1317 = vmatmul.f32.gmra.mxu3 %v1097_v44  ;;  %v987_v44 = vpop.f32.mrf.mxu3  ;;  %1217 = vmatmul.f32.gmra.mxu1 %v889_v40 }
 0x148   : > { %v988_v45 = vadd.f32 %v2483_v36, %v987_v44 }
 0x14a   : > { %v1058_v49 = vpop.f32.mrf.mxu0  ;;  %v1007_v47 = vmax.f32 %v988_v45, 0.0 }
 0x14b   : > { %v1059_v50 = vadd.f32 %v2500_v8, %v1058_v49  ;;  %v871_v49 = vadd.f32 %v2488_v41, %v870_v48 }
 0x14c   : > { %1285 = vmatmul.f32.gmra.mxu2 %v1007_v47 }
 0x14d   : > { %v1098_v53 = vmax.f32 %v1059_v50, 0.0  ;;  %v890_v50 = vmax.f32 %v871_v49, 0.0  ;;  %v873_v57 = vpop.f32.mrf.mxu2 }
 0x14f   : > { %1320 = vmatmul.f32.gmra.mxu3 %v1098_v53  ;;  %v990_v53 = vpop.f32.mrf.mxu3  ;;  %1220 = vmatmul.f32.gmra.mxu1 %v890_v50 }
 0x150   : > { %v991_v54 = vadd.f32 %v2483_v36, %v990_v53 }
 0x152   : > { %v1061_v58 = vpop.f32.mrf.mxu0  ;;  %v1008_v56 = vmax.f32 %v991_v54, 0.0  ;;  %v1179_v63 = vpop.f32.mrf.mxu1 }
 0x153   : > { %v1062_v59 = vadd.f32 %v2500_v8, %v1061_v58  ;;  %v874_v58 = vadd.f32 %v2488_v41, %v873_v57 }
 0x154   : > { %1288 = vmatmul.f32.gmra.mxu2 %v1008_v56 }
 0x155   : > { %v1099_v62 = vmax.f32 %v1062_v59, 0.0  ;;  %v891_v59 = vmax.f32 %v874_v58, 0.0  ;;  %v1244_v2 = vpop.f32.mrf.mxu2 }
 0x157   : > { %1323 = vmatmul.f32.gmra.mxu3 %v1099_v62  ;;  %1223 = vmatmul.f32.gmra.mxu1 %v891_v59 }
 0x15a   : > { %v1064_v3 = vpop.f32.mrf.mxu0 }
 0x15b   : > { %v1065_v4 = vadd.f32 %v2500_v8, %v1064_v3 }
 0x15c   : > { %v1182_v3 = vpop.f32.mrf.mxu1 }
 0x15d   : > { %v1100_v7 = vmax.f32 %v1065_v4, 0.0  ;;  %v1247_v41 = vpop.f32.mrf.mxu2 }
 0x15f   : > { %1326 = vmatmul.f32.gmra.mxu3 %v1100_v7 }
 0x162   : > { %v1067_v13 = vpop.f32.mrf.mxu0 }
 0x163   : > { %v1068_v14 = vadd.f32 %v2500_v8, %v1067_v13  ;;  %v2546_v13 = vld [vmem:[%s2612_s11] ss:$0 sm:$0xff] }
 0x164   : > { %v1185_v7 = vpop.f32.mrf.mxu1  ;;  %v1180_v15 = vadd.f32 %v2546_v13, %v1179_v63  ;;  %v1183_v21 = vadd.f32 %v2546_v13, %v1182_v3 }
 0x165   : > { %v1101_v17 = vmax.f32 %v1068_v14, 0.0 }
 0x167   : > { %1329 = vmatmul.f32.gmra.mxu3 %v1101_v17  ;;  %v1245_v17 = vadd.f32 %v1244_v2, %v1180_v15 }
 0x168   : > { %v1250_v11 = vpop.f32.mrf.mxu2 }
 0x16a   : > { %v1070_v22 = vpop.f32.mrf.mxu0 }
 0x16b   : > { %v1071_v23 = vadd.f32 %v2500_v8, %v1070_v22 }
 0x16d   : > { %v1102_v26 = vmax.f32 %v1071_v23, 0.0  ;;  %v1188_v14 = vpop.f32.mrf.mxu1  ;;  %v1248_v23 = vadd.f32 %v1247_v41, %v1183_v21 }
 0x16f   : > { %1332 = vmatmul.f32.gmra.mxu3 %v1102_v26  ;;  %v1186_v26 = vadd.f32 %v2546_v13, %v1185_v7 }
 0x171   : > { %v1253_v16 = vpop.f32.mrf.mxu2 }
 0x172   : > { %v1073_v31 = vpop.f32.mrf.mxu0 }
 0x173   : > { %v1074_v32 = vadd.f32 %v2500_v8, %v1073_v31  ;;  %v1251_v31 = vadd.f32 %v1250_v11, %v1186_v26 }
 0x175   : > { %v1103_v35 = vmax.f32 %v1074_v32, 0.0 }
 0x177   : > { %1335 = vmatmul.f32.gmra.mxu3 %v1103_v35  ;;  %v1191_v18 = vpop.f32.mrf.mxu1  ;;  %v1189_v35 = vadd.f32 %v2546_v13, %v1188_v14 }
 0x178   : > { %v1192_v49 = vadd.f32 %v2546_v13, %v1191_v18 }
 0x179   : > { %v1254_v44 = vadd.f32 %v1253_v16, %v1189_v35 }
 0x17a   : > { %v1076_v42 = vpop.f32.mrf.mxu0 }
 0x17b   : > { %v1077_v43 = vadd.f32 %v2500_v8, %v1076_v42 }
 0x17d   : > { %v1104_v46 = vmax.f32 %v1077_v43, 0.0 }
 0x17f   : > { %1338 = vmatmul.f32.gmra.mxu3 %v1104_v46  ;;  %v1194_v27 = vpop.f32.mrf.mxu1 }
 0x182   : > { %v1079_v51 = vpop.f32.mrf.mxu0 }
 0x183   : > { %v1080_v52 = vadd.f32 %v2500_v8, %v1079_v51 }
 0x185   : > { %v1105_v55 = vmax.f32 %v1080_v52, 0.0 }
 0x187   : > { %1341 = vmatmul.f32.gmra.mxu3 %v1105_v55 }
 0x18a   : > { %v1082_v60 = vpop.f32.mrf.mxu0 }
 0x18b   : > { %v1083_v61 = vadd.f32 %v2500_v8, %v1082_v60 }
 0x18c   : > { %v2552_v39 = vpop.f32.mrf.mxu1 }
 0x18d   : > { %v1106_v62 = vmax.f32 %v1083_v61, 0.0 }
 0x18f   : > { %1344 = vmatmul.f32.gmra.mxu3 %v1106_v62 }
 0x192   : > { %v1085_v0 = vpop.f32.mrf.mxu0 }
 0x193   : > { %v1086_v1 = vadd.f32 %v2500_v8, %v1085_v0 }
 0x194   : > { %v1200_v62 = vpop.f32.mrf.mxu1 }
 0x195   : > { %v1107_v36 = vmax.f32 %v1086_v1, 0.0 }
 0x197   : > { %1347 = vmatmul.f32.gmra.mxu3 %v1107_v36  ;;  %v1195_v36 = vadd.f32 %v2546_v13, %v1194_v27 }
 0x19a   : > { %v1088_v4 = vpop.f32.mrf.mxu0 }
 0x19b   : > { %v1089_v5 = vadd.f32 %v2500_v8, %v1088_v4 }
 0x19d   : > { %v1108_v6 = vmax.f32 %v1089_v5, 0.0 }
 0x19f   : > { %1350 = vmatmul.f32.gmra.mxu3 %v1108_v6 }
 0x1a2   : > { %v1091_v9 = vpop.f32.mrf.mxu0 }
 0x1a3   : > { %v1092_v10 = vadd.f32 %v2500_v8, %v1091_v9  ;;  %v1256_v8 = vpop.f32.mrf.mxu2 }
 0x1a4   : > { %v1257_v59 = vadd.f32 %v1256_v8, %v1192_v49 }
 0x1a5   : > { %v1109_v12 = vmax.f32 %v1092_v10, 0.0 }
 0x1a7   : > { %1353 = vmatmul.f32.gmra.mxu3 %v1109_v12 }
 0x1ab   : > { %v1259_v32 = vpop.f32.mrf.mxu2 }
 0x1ac   : > { %v1260_v14 = vadd.f32 %v1259_v32, %v1195_v36 }
 0x1b2   : > { %v1309_v19 = vpop.f32.mrf.mxu3 }
 0x1b3   : > { %v1310_v20 = vadd.f32 %v1309_v19, %v1245_v17  ;;  %v2554_v46 = vpop.f32.mrf.mxu2  ;;  %v1203_v19 = vpop.f32.mrf.mxu1 }
 0x1b5   : > { %v1788_v22 = vmul.f32 -1.442695, %v1310_v20 }
 0x1b7   : > { %1835 = vpow2.f32 %v1788_v22  ;;  %v1198_v22 = vadd.f32 %v2546_v13, %v2552_v39 }
 0x1b9   : > { %v1263_v32 = vadd.f32 %v2554_v46, %v1198_v22 }
 0x1ba   : > { %v1312_v24 = vpop.f32.mrf.mxu3 }
 0x1bb   : > { %v1313_v25 = vadd.f32 %v1312_v24, %v1248_v23  ;;  %v1265_v41 = vpop.f32.mrf.mxu2 }
 0x1bd   : > { %v1836_v28 = vpop.eup %1835  ;;  %v1789_v29 = vmul.f32 -1.442695, %v1313_v25 }
 0x1be   : > { %v1405_v30 = vadd.f32 1.0, %v1836_v28 }
 0x1bf   : > { %1837 = vpow2.f32 %v1789_v29 }
 0x1c0   : > { %1839 = vrcp.f32 %v1405_v30  ;;  %v1432_v47 = vand.u32 2147483648, %v1405_v30  ;;  %v1430_v51 = vand.u32 2147483647, %v1405_v30  ;;  %vm1426_vm1 = vweird.f32 %v1405_v30 }
 0x1c2   : > { %v1315_v33 = vpop.f32.mrf.mxu3  ;;  %v1433_v57 = vor.u32 1.1754944e-38, %v1432_v47  ;;  %vm1431_vm3 = vcmp.eq.f32.partialorder %v1430_v51, 8.507059e+37 }
 0x1c3   : > { %v1316_v34 = vadd.f32 %v1315_v33, %v1251_v31  ;;  %v1268_v28 = vpop.f32.mrf.mxu2 }
 0x1c5   : > { %v1838_v37 = vpop.eup %1837  ;;  %v1790_v38 = vmul.f32 -1.442695, %v1316_v34 }
 0x1c6   : > { %v1840_v40 = vpop.eup %1839  ;;  %v1406_v42 = vadd.f32 1.0, %v1838_v37 }
 0x1c7   : > { %v1422_v43 = vmul.f32 %v1840_v40, %v1405_v30  ;;  %1841 = vpow2.f32 %v1790_v38  ;;  %vm1427_vm0 = vweird.f32 %v1840_v40 }
 0x1c8   : > { %1843 = vrcp.f32 %v1406_v42  ;;  %vm1428_vm2 = vmor %vm1426_vm1, %vm1427_vm0  ;;  %v1447_v1 = vand.u32 2147483648, %v1406_v42  ;;  %v1445_v4 = vand.u32 2147483647, %v1406_v42  ;;  %vm1441_vm5 = vweird.f32 %v1406_v42 }
 0x1c9   : > { %v1423_v45 = vsub.f32 1.0, %v1422_v43 }
 0x1ca   : > { %v1318_v48 = vpop.f32.mrf.mxu3  ;;  %v1448_v11 = vor.u32 1.1754944e-38, %v1447_v1  ;;  %vm1446_vm7 = vcmp.eq.f32.partialorder %v1445_v4, 8.507059e+37 }
 0x1cb   : > { %v1424_v50 = vmul.f32 %v1840_v40, %v1423_v45  ;;  %v1319_v52 = vadd.f32 %v1318_v48, %v1254_v44  ;;  %v1206_v45 = vpop.f32.mrf.mxu1 }
 0x1cd   : > { %v1842_v53 = vpop.eup %1841  ;;  %v1425_v54 = vadd.f32 %v1840_v40, %v1424_v50  ;;  %v1791_v55 = vmul.f32 -1.442695, %v1319_v52 }
 0x1ce   : > { %v1844_v56 = vpop.eup %1843  ;;  %v1407_v58 = vadd.f32 1.0, %v1842_v53 }
 0x1cf   : > { %v1429_v60 = vsel %vm1428_vm2, %v1840_v40, %v1425_v54  ;;  %v1437_v61 = vmul.f32 %v1844_v56, %v1406_v42  ;;  %1845 = vpow2.f32 %v1791_v55  ;;  %vm1442_vm4 = vweird.f32 %v1844_v56  ;;  %v1271_v55 = vpop.f32.mrf.mxu2 }
 0x1d0   : > { %v1434_v63 = vsel %vm1431_vm3, %v1433_v57, %v1429_v60  ;;  %1847 = vrcp.f32 %v1407_v58  ;;  %vm1443_vm6 = vmor %vm1441_vm5, %vm1442_vm4  ;;  %v1462_v20 = vand.u32 2147483648, %v1407_v58  ;;  %v1460_v23 = vand.u32 2147483647, %v1407_v58 }
 0x1d1   : > { %1661 = vst [vmem:[%s2561_s14] sm:$0xff] %v1434_v63  ;;  %v1438_v0 = vsub.f32 1.0, %v1437_v61  ;;  %vm1456_vm9 = vweird.f32 %v1407_v58  ;;  %v1201_v40 = vadd.f32 %v2546_v13, %v1200_v62  ;;  %v1204_v60 = vadd.f32 %v2546_v13, %v1203_v19 }
 0x1d2   : > { %v1321_v2 = vpop.f32.mrf.mxu3  ;;  %v1463_v30 = vor.u32 1.1754944e-38, %v1462_v20  ;;  %vm1461_vm11 = vcmp.eq.f32.partialorder %v1460_v23, 8.507059e+37 }
 0x1d3   : > { %v1439_v3 = vmul.f32 %v1844_v56, %v1438_v0  ;;  %v1322_v5 = vadd.f32 %v1321_v2, %v1257_v59  ;;  %v1266_v52 = vadd.f32 %v1265_v41, %v1201_v40  ;;  %v1209_v36 = vpop.f32.mrf.mxu1  ;;  %v1269_v41 = vadd.f32 %v1268_v28, %v1204_v60 }
 0x1d5   : > { %v1846_v6 = vpop.eup %1845  ;;  %v1440_v7 = vadd.f32 %v1844_v56, %v1439_v3  ;;  %v1792_v9 = vmul.f32 -1.442695, %v1322_v5 }
 0x1d6   : > { %v1848_v10 = vpop.eup %1847  ;;  %v1408_v12 = vadd.f32 1.0, %v1846_v6 }
 0x1d7   : > { %v1444_v15 = vsel %vm1443_vm6, %v1844_v56, %v1440_v7  ;;  %v1452_v16 = vmul.f32 %v1848_v10, %v1407_v58  ;;  %1849 = vpow2.f32 %v1792_v9  ;;  %vm1457_vm8 = vweird.f32 %v1848_v10 }
 0x1d8   : > { %v1449_v17 = vsel %vm1446_vm7, %v1448_v11, %v1444_v15  ;;  %1851 = vrcp.f32 %v1408_v12  ;;  %vm1458_vm10 = vmor %vm1456_vm9, %vm1457_vm8  ;;  %v1477_v38 = vand.u32 2147483648, %v1408_v12  ;;  %v1475_v43 = vand.u32 2147483647, %v1408_v12  ;;  %v1274_v11 = vpop.f32.mrf.mxu2 }
 0x1d9   : > { %1662 = vst [vmem:[%s2561_s14 + $0x8] sm:$0xff] %v1449_v17  ;;  %v1453_v18 = vsub.f32 1.0, %v1452_v16  ;;  %vm1471_vm13 = vweird.f32 %v1408_v12  ;;  %v1207_v15 = vadd.f32 %v2546_v13, %v1206_v45 }
 0x1da   : > { %v1324_v21 = vpop.f32.mrf.mxu3  ;;  %v1478_v50 = vor.u32 1.1754944e-38, %v1477_v38  ;;  %vm1476_vm15 = vcmp.eq.f32.partialorder %v1475_v43, 8.507059e+37 }
 0x1db   : > { %v1454_v8 = vmul.f32 %v1848_v10, %v1453_v18  ;;  %v1325_v24 = vadd.f32 %v1324_v21, %v1260_v14 }
 0x1dd   : > { %v1850_v25 = vpop.eup %1849  ;;  %v1455_v26 = vadd.f32 %v1848_v10, %v1454_v8  ;;  %v1793_v27 = vmul.f32 -1.442695, %v1325_v24  ;;  %v1272_v24 = vadd.f32 %v1271_v55, %v1207_v15 }
 0x1de   : > { %v1852_v29 = vpop.eup %1851  ;;  %v1409_v31 = vadd.f32 1.0, %v1850_v25 }
 0x1df   : > { %v1459_v33 = vsel %vm1458_vm10, %v1848_v10, %v1455_v26  ;;  %v1467_v34 = vmul.f32 %v1852_v29, %v1408_v12  ;;  %1853 = vpow2.f32 %v1793_v27  ;;  %vm1472_vm12 = vweird.f32 %v1852_v29  ;;  %v1212_v27 = vpop.f32.mrf.mxu1 }
 0x1e0   : > { %v1464_v35 = vsel %vm1461_vm11, %v1463_v30, %v1459_v33  ;;  %1855 = vrcp.f32 %v1409_v31  ;;  %vm1473_vm14 = vmor %vm1471_vm13, %vm1472_vm12  ;;  %v1492_v58 = vand.u32 2147483648, %v1409_v31  ;;  %v1490_v62 = vand.u32 2147483647, %v1409_v31 }
 0x1e1   : > { %1663 = vst [vmem:[%s2561_s14 + $0x10] sm:$0xff] %v1464_v35  ;;  %v1468_v37 = vsub.f32 1.0, %v1467_v34  ;;  %vm1486_vm1 = vweird.f32 %v1409_v31 }
 0x1e2   : > { %v1327_v39 = vpop.f32.mrf.mxu3  ;;  %v1493_v4 = vor.u32 1.1754944e-38, %v1492_v58  ;;  %vm1491_vm3 = vcmp.eq.f32.partialorder %v1490_v62, 8.507059e+37 }
 0x1e3   : > { %v1469_v42 = vmul.f32 %v1852_v29, %v1468_v37  ;;  %v1328_v44 = vadd.f32 %v1327_v39, %v1263_v32  ;;  %v1210_v32 = vadd.f32 %v2546_v13, %v1209_v36  ;;  %v1277_v37 = vpop.f32.mrf.mxu2 }
 0x1e5   : > { %v1854_v47 = vpop.eup %1853  ;;  %v1470_v46 = vadd.f32 %v1852_v29, %v1469_v42  ;;  %v1794_v48 = vmul.f32 -1.442695, %v1328_v44  ;;  %v1275_v45 = vadd.f32 %v1274_v11, %v1210_v32 }
 0x1e6   : > { %v1856_v49 = vpop.eup %1855  ;;  %v1410_v51 = vadd.f32 1.0, %v1854_v47 }
 0x1e7   : > { %v1474_v53 = vsel %vm1473_vm14, %v1852_v29, %v1470_v46  ;;  %v1482_v54 = vmul.f32 %v1856_v49, %v1409_v31  ;;  %1857 = vpow2.f32 %v1794_v48  ;;  %vm1487_vm0 = vweird.f32 %v1856_v49 }
 0x1e8   : > { %v1479_v56 = vsel %vm1476_vm15, %v1478_v50, %v1474_v53  ;;  %1859 = vrcp.f32 %v1410_v51  ;;  %vm1488_vm2 = vmor %vm1486_vm1, %vm1487_vm0  ;;  %v1507_v12 = vand.u32 2147483648, %v1410_v51  ;;  %v1505_v17 = vand.u32 2147483647, %v1410_v51  ;;  %v1215_v50 = vpop.f32.mrf.mxu1 }
 0x1e9   : > { %1664 = vst [vmem:[%s2561_s14 + $0x18] sm:$0xff] %v1479_v56  ;;  %v1483_v57 = vsub.f32 1.0, %v1482_v54  ;;  %vm1501_vm5 = vweird.f32 %v1410_v51  ;;  %v1213_v53 = vadd.f32 %v2546_v13, %v1212_v27 }
 0x1ea   : > { %v1330_v59 = vpop.f32.mrf.mxu3  ;;  %v1508_v8 = vor.u32 1.1754944e-38, %v1507_v12  ;;  %vm1506_vm7 = vcmp.eq.f32.partialorder %v1505_v17, 8.507059e+37 }
 0x1eb   : > { %v1484_v61 = vmul.f32 %v1856_v49, %v1483_v57  ;;  %v1331_v63 = vadd.f32 %v1330_v59, %v1266_v52  ;;  %v1280_v60 = vpop.f32.mrf.mxu2 }
 0x1ed   : > { %v1858_v0 = vpop.eup %1857  ;;  %v1485_v1 = vadd.f32 %v1856_v49, %v1484_v61  ;;  %v1795_v2 = vmul.f32 -1.442695, %v1331_v63 }
 0x1ee   : > { %v1860_v3 = vpop.eup %1859  ;;  %v1411_v5 = vadd.f32 1.0, %v1858_v0  ;;  %v1278_v0 = vadd.f32 %v1277_v37, %v1213_v53 }
 0x1ef   : > { %v1489_v6 = vsel %vm1488_vm2, %v1856_v49, %v1485_v1  ;;  %v1497_v7 = vmul.f32 %v1860_v3, %v1410_v51  ;;  %1861 = vpow2.f32 %v1795_v2  ;;  %vm1502_vm4 = vweird.f32 %v1860_v3 }
 0x1f0   : > { %v1494_v9 = vsel %vm1491_vm3, %v1493_v4, %v1489_v6  ;;  %1863 = vrcp.f32 %v1411_v5  ;;  %vm1503_vm6 = vmor %vm1501_vm5, %vm1502_vm4  ;;  %v1522_v30 = vand.u32 2147483648, %v1411_v5  ;;  %v1520_v34 = vand.u32 2147483647, %v1411_v5 }
 0x1f1   : > { %1665 = vst [vmem:[%s2561_s14 + $0x20] sm:$0xff] %v1494_v9  ;;  %v1498_v10 = vsub.f32 1.0, %v1497_v7  ;;  %vm1516_vm9 = vweird.f32 %v1411_v5 }
 0x1f2   : > { %v1333_v14 = vpop.f32.mrf.mxu3  ;;  %v1523_v43 = vor.u32 1.1754944e-38, %v1522_v30  ;;  %vm1521_vm11 = vcmp.eq.f32.partialorder %v1520_v34, 8.507059e+37 }
 0x1f3   : > { %v1499_v16 = vmul.f32 %v1860_v3, %v1498_v10  ;;  %v1334_v18 = vadd.f32 %v1333_v14, %v1269_v41  ;;  %v1216_v41 = vadd.f32 %v2546_v13, %v1215_v50  ;;  %v1218_v10 = vpop.f32.mrf.mxu1 }
 0x1f5   : > { %v1862_v19 = vpop.eup %1861  ;;  %v1500_v20 = vadd.f32 %v1860_v3, %v1499_v16  ;;  %v1796_v21 = vmul.f32 -1.442695, %v1334_v18  ;;  %v1281_v18 = vadd.f32 %v1280_v60, %v1216_v41 }
 0x1f6   : > { %v1864_v22 = vpop.eup %1863  ;;  %v1412_v23 = vadd.f32 1.0, %v1862_v19 }
 0x1f7   : > { %v1504_v25 = vsel %vm1503_vm6, %v1860_v3, %v1500_v20  ;;  %v1512_v26 = vmul.f32 %v1864_v22, %v1411_v5  ;;  %1865 = vpow2.f32 %v1796_v21  ;;  %vm1517_vm8 = vweird.f32 %v1864_v22  ;;  %v1283_v21 = vpop.f32.mrf.mxu2 }
 0x1f8   : > { %v1509_v28 = vsel %vm1506_vm7, %v1508_v8, %v1504_v25  ;;  %1867 = vrcp.f32 %v1412_v23  ;;  %vm1518_vm10 = vmor %vm1516_vm9, %vm1517_vm8  ;;  %v1537_v51 = vand.u32 2147483648, %v1412_v23  ;;  %v1535_v55 = vand.u32 2147483647, %v1412_v23 }
 0x1f9   : > { %1666 = vst [vmem:[%s2561_s14 + $0x28] sm:$0xff] %v1509_v28  ;;  %v1513_v29 = vsub.f32 1.0, %v1512_v26  ;;  %vm1531_vm13 = vweird.f32 %v1412_v23  ;;  %v1219_v25 = vadd.f32 %v2546_v13, %v1218_v10 }
 0x1fa   : > { %v1336_v31 = vpop.f32.mrf.mxu3  ;;  %v1538_v62 = vor.u32 1.1754944e-38, %v1537_v51  ;;  %vm1536_vm15 = vcmp.eq.f32.partialorder %v1535_v55, 8.507059e+37 }
 0x1fb   : > { %v1514_v33 = vmul.f32 %v1864_v22, %v1513_v29  ;;  %v1337_v35 = vadd.f32 %v1336_v31, %v1272_v24  ;;  %v1221_v32 = vpop.f32.mrf.mxu1  ;;  %v1284_v37 = vadd.f32 %v1283_v21, %v1219_v25 }
 0x1fd   : > { %v1866_v38 = vpop.eup %1865  ;;  %v1515_v39 = vadd.f32 %v1864_v22, %v1514_v33  ;;  %v1797_v40 = vmul.f32 -1.442695, %v1337_v35 }
 0x1fe   : > { %v1868_v42 = vpop.eup %1867  ;;  %v1413_v44 = vadd.f32 1.0, %v1866_v38 }
 0x1ff   : > { %v1519_v47 = vsel %vm1518_vm10, %v1864_v22, %v1515_v39  ;;  %v1527_v46 = vmul.f32 %v1868_v42, %v1412_v23  ;;  %1869 = vpow2.f32 %v1797_v40  ;;  %vm1532_vm12 = vweird.f32 %v1868_v42 }
 0x200   : > { %v1524_v48 = vsel %vm1521_vm11, %v1523_v43, %v1519_v47  ;;  %1871 = vrcp.f32 %v1413_v44  ;;  %vm1533_vm14 = vmor %vm1531_vm13, %vm1532_vm12  ;;  %v1552_v4 = vand.u32 2147483648, %v1413_v44  ;;  %v1550_v7 = vand.u32 2147483647, %v1413_v44  ;;  %v1286_v43 = vpop.f32.mrf.mxu2 }
 0x201   : > { %1667 = vst [vmem:[%s2561_s14 + $0x30] sm:$0xff] %v1524_v48  ;;  %v1528_v49 = vsub.f32 1.0, %v1527_v46  ;;  %vm1546_vm1 = vweird.f32 %v1413_v44  ;;  %v1222_v47 = vadd.f32 %v2546_v13, %v1221_v32 }
 0x202   : > { %v1339_v52 = vpop.f32.mrf.mxu3  ;;  %v1553_v16 = vor.u32 1.1754944e-38, %v1552_v4  ;;  %vm1551_vm3 = vcmp.eq.f32.partialorder %v1550_v7, 8.507059e+37 }
 0x203   : > { %v1529_v54 = vmul.f32 %v1868_v42, %v1528_v49  ;;  %v1340_v56 = vadd.f32 %v1339_v52, %v1275_v45 }
 0x205   : > { %v1870_v57 = vpop.eup %1869  ;;  %v1530_v58 = vadd.f32 %v1868_v42, %v1529_v54  ;;  %v1798_v59 = vmul.f32 -1.442695, %v1340_v56  ;;  %v1287_v56 = vadd.f32 %v1286_v43, %v1222_v47 }
 0x206   : > { %v1872_v61 = vpop.eup %1871  ;;  %v1414_v63 = vadd.f32 1.0, %v1870_v57 }
 0x207   : > { %v1534_v1 = vsel %vm1533_vm14, %v1868_v42, %v1530_v58  ;;  %v1542_v2 = vmul.f32 %v1872_v61, %v1413_v44  ;;  %1873 = vpow2.f32 %v1798_v59  ;;  %vm1547_vm0 = vweird.f32 %v1872_v61  ;;  %v1224_v59 = vpop.f32.mrf.mxu1 }
 0x208   : > { %v1539_v36 = vsel %vm1536_vm15, %v1538_v62, %v1534_v1  ;;  %1875 = vrcp.f32 %v1414_v63  ;;  %vm1548_vm2 = vmor %vm1546_vm1, %vm1547_vm0  ;;  %v1567_v23 = vand.u32 2147483648, %v1414_v63  ;;  %v1565_v27 = vand.u32 2147483647, %v1414_v63 }
 0x209   : > { %1668 = vst [vmem:[%s2561_s14 + $0x38] sm:$0xff] %v1539_v36  ;;  %v1543_v3 = vsub.f32 1.0, %v1542_v2  ;;  %vm1561_vm5 = vweird.f32 %v1414_v63 }
 0x20a   : > { %v1342_v5 = vpop.f32.mrf.mxu3  ;;  %v1568_v34 = vor.u32 1.1754944e-38, %v1567_v23  ;;  %vm1566_vm7 = vcmp.eq.f32.partialorder %v1565_v27, 8.507059e+37 }
 0x20b   : > { %v1544_v6 = vmul.f32 %v1872_v61, %v1543_v3  ;;  %v1343_v9 = vadd.f32 %v1342_v5, %v1278_v0  ;;  %v1225_v0 = vadd.f32 %v2546_v13, %v1224_v59  ;;  %v1289_v3 = vpop.f32.mrf.mxu2 }
 0x20d   : > { %v1874_v11 = vpop.eup %1873  ;;  %v1545_v12 = vadd.f32 %v1872_v61, %v1544_v6  ;;  %v1799_v14 = vmul.f32 -1.442695, %v1343_v9  ;;  %v1290_v10 = vadd.f32 %v1289_v3, %v1225_v0 }
 0x20e   : > { %v1876_v15 = vpop.eup %1875  ;;  %v1415_v17 = vadd.f32 1.0, %v1874_v11 }
 0x20f   : > { %v1549_v19 = vsel %vm1548_vm2, %v1872_v61, %v1545_v12  ;;  %v1557_v20 = vmul.f32 %v1876_v15, %v1414_v63  ;;  %1877 = vpow2.f32 %v1799_v14  ;;  %vm1562_vm4 = vweird.f32 %v1876_v15 }
 0x210   : > { %v1554_v22 = vsel %vm1551_vm3, %v1553_v16, %v1549_v19  ;;  %1879 = vrcp.f32 %v1415_v17  ;;  %vm1563_vm6 = vmor %vm1561_vm5, %vm1562_vm4  ;;  %v1582_v44 = vand.u32 2147483648, %v1415_v17  ;;  %v1580_v48 = vand.u32 2147483647, %v1415_v17 }
 0x211   : > { %1669 = vst [vmem:[%s2561_s14 + $0x40] sm:$0xff] %v1554_v22  ;;  %v1558_v8 = vsub.f32 1.0, %v1557_v20  ;;  %vm1576_vm9 = vweird.f32 %v1415_v17 }
 0x212   : > { %v1345_v24 = vpop.f32.mrf.mxu3  ;;  %v1583_v54 = vor.u32 1.1754944e-38, %v1582_v44  ;;  %vm1581_vm11 = vcmp.eq.f32.partialorder %v1580_v48, 8.507059e+37 }
 0x213   : > { %v1559_v26 = vmul.f32 %v1876_v15, %v1558_v8  ;;  %v1346_v28 = vadd.f32 %v1345_v24, %v1281_v18 }
 0x215   : > { %v1878_v29 = vpop.eup %1877  ;;  %v1560_v30 = vadd.f32 %v1876_v15, %v1559_v26  ;;  %v1800_v31 = vmul.f32 -1.442695, %v1346_v28 }
 0x216   : > { %v1880_v33 = vpop.eup %1879  ;;  %v1416_v35 = vadd.f32 1.0, %v1878_v29 }
 0x217   : > { %v1564_v38 = vsel %vm1563_vm6, %v1876_v15, %v1560_v30  ;;  %v1572_v39 = vmul.f32 %v1880_v33, %v1415_v17  ;;  %1881 = vpow2.f32 %v1800_v31  ;;  %vm1577_vm8 = vweird.f32 %v1880_v33 }
 0x218   : > { %v1569_v40 = vsel %vm1566_vm7, %v1568_v34, %v1564_v38  ;;  %1883 = vrcp.f32 %v1416_v35  ;;  %vm1578_vm10 = vmor %vm1576_vm9, %vm1577_vm8  ;;  %v1597_v62 = vand.u32 2147483648, %v1416_v35  ;;  %v1595_v2 = vand.u32 2147483647, %v1416_v35 }
 0x219   : > { %1670 = vst [vmem:[%s2561_s14 + $0x48] sm:$0xff] %v1569_v40  ;;  %v1573_v42 = vsub.f32 1.0, %v1572_v39  ;;  %vm1591_vm13 = vweird.f32 %v1416_v35 }
 0x21a   : > { %v1348_v45 = vpop.f32.mrf.mxu3  ;;  %v1598_v7 = vor.u32 1.1754944e-38, %v1597_v62  ;;  %vm1596_vm15 = vcmp.eq.f32.partialorder %v1595_v2, 8.507059e+37 }
 0x21b   : > { %v1574_v46 = vmul.f32 %v1880_v33, %v1573_v42  ;;  %v1349_v49 = vadd.f32 %v1348_v45, %v1284_v37 }
 0x21d   : > { %v1882_v50 = vpop.eup %1881  ;;  %v1575_v51 = vadd.f32 %v1880_v33, %v1574_v46  ;;  %v1801_v52 = vmul.f32 -1.442695, %v1349_v49 }
 0x21e   : > { %v1884_v53 = vpop.eup %1883  ;;  %v1417_v55 = vadd.f32 1.0, %v1882_v50 }
 0x21f   : > { %v1579_v57 = vsel %vm1578_vm10, %v1880_v33, %v1575_v51  ;;  %v1587_v58 = vmul.f32 %v1884_v53, %v1416_v35  ;;  %1885 = vpow2.f32 %v1801_v52  ;;  %vm1592_vm12 = vweird.f32 %v1884_v53 }
 0x220   : > { %v1584_v60 = vsel %vm1581_vm11, %v1583_v54, %v1579_v57  ;;  %1887 = vrcp.f32 %v1417_v55  ;;  %vm1593_vm14 = vmor %vm1591_vm13, %vm1592_vm12  ;;  %v1612_v15 = vand.u32 2147483648, %v1417_v55  ;;  %v1610_v18 = vand.u32 2147483647, %v1417_v55 }
 0x221   : > { %1671 = vst [vmem:[%s2561_s14 + $0x50] sm:$0xff] %v1584_v60  ;;  %v1588_v61 = vsub.f32 1.0, %v1587_v58  ;;  %vm1606_vm1 = vweird.f32 %v1417_v55 }
 0x222   : > { %v1351_v63 = vpop.f32.mrf.mxu3  ;;  %v1613_v23 = vor.u32 1.1754944e-38, %v1612_v15  ;;  %vm1611_vm3 = vcmp.eq.f32.partialorder %v1610_v18, 8.507059e+37 }
 0x223   : > { %v1589_v1 = vmul.f32 %v1884_v53, %v1588_v61  ;;  %v1352_v36 = vadd.f32 %v1351_v63, %v1287_v56 }
 0x225   : > { %v1886_v4 = vpop.eup %1885  ;;  %v1590_v5 = vadd.f32 %v1884_v53, %v1589_v1  ;;  %v1802_v41 = vmul.f32 -1.442695, %v1352_v36 }
 0x226   : > { %v1888_v6 = vpop.eup %1887  ;;  %v1418_v9 = vadd.f32 1.0, %v1886_v4 }
 0x227   : > { %v1594_v11 = vsel %vm1593_vm14, %v1884_v53, %v1590_v5  ;;  %v1602_v12 = vmul.f32 %v1888_v6, %v1417_v55  ;;  %1889 = vpow2.f32 %v1802_v41  ;;  %vm1607_vm0 = vweird.f32 %v1888_v6 }
 0x228   : > { %v1599_v13 = vsel %vm1596_vm15, %v1598_v7, %v1594_v11  ;;  %1891 = vrcp.f32 %v1418_v9  ;;  %vm1608_vm2 = vmor %vm1606_vm1, %vm1607_vm0  ;;  %v1627_v29 = vand.u32 2147483648, %v1418_v9  ;;  %v1625_v31 = vand.u32 2147483647, %v1418_v9 }
 0x229   : > { %1672 = vst [vmem:[%s2561_s14 + $0x58] sm:$0xff] %v1599_v13  ;;  %v1603_v14 = vsub.f32 1.0, %v1602_v12  ;;  %vm1621_vm5 = vweird.f32 %v1418_v9 }
 0x22a   : > { %v1354_v16 = vpop.f32.mrf.mxu3  ;;  %v1628_v35 = vor.u32 1.1754944e-38, %v1627_v29  ;;  %vm1626_vm7 = vcmp.eq.f32.partialorder %v1625_v31, 8.507059e+37 }
 0x22b   : > { %v1604_v17 = vmul.f32 %v1888_v6, %v1603_v14  ;;  %v1355_v19 = vadd.f32 %v1354_v16, %v1290_v10 }
 0x22d   : > { %v1890_v20 = vpop.eup %1889  ;;  %v1605_v21 = vadd.f32 %v1888_v6, %v1604_v17  ;;  %v1803_v22 = vmul.f32 -1.442695, %v1355_v19 }
 0x22e   : > { %v1892_v8 = vpop.eup %1891  ;;  %v1419_v24 = vadd.f32 1.0, %v1890_v20 }
 0x22f   : > { %v1609_v25 = vsel %vm1608_vm2, %v1888_v6, %v1605_v21  ;;  %v1617_v26 = vmul.f32 %v1892_v8, %v1418_v9  ;;  %1893 = vpow2.f32 %v1803_v22  ;;  %vm1622_vm4 = vweird.f32 %v1892_v8 }
 0x230   : > { %v1614_v27 = vsel %vm1611_vm3, %v1613_v23, %v1609_v25  ;;  %1895 = vrcp.f32 %v1419_v24  ;;  %vm1623_vm6 = vmor %vm1621_vm5, %vm1622_vm4  ;;  %v1642_v43 = vand.u32 2147483648, %v1419_v24  ;;  %v1640_v45 = vand.u32 2147483647, %v1419_v24 }
 0x231   : > { %1673 = vst [vmem:[%s2561_s14 + $0x60] sm:$0xff] %v1614_v27  ;;  %v1618_v28 = vsub.f32 1.0, %v1617_v26  ;;  %vm1636_vm9 = vweird.f32 %v1419_v24 }
 0x232   : > { %v1643_v48 = vor.u32 1.1754944e-38, %v1642_v43  ;;  %vm1641_vm11 = vcmp.eq.f32.partialorder %v1640_v45, 8.507059e+37 }
 0x233   : > { %v1619_v30 = vmul.f32 %v1892_v8, %v1618_v28 }
 0x235   : > { %v1894_v32 = vpop.eup %1893  ;;  %v1620_v33 = vadd.f32 %v1892_v8, %v1619_v30 }
 0x236   : > { %v1896_v34 = vpop.eup %1895  ;;  %v1420_v37 = vadd.f32 1.0, %v1894_v32 }
 0x237   : > { %v1624_v38 = vsel %vm1623_vm6, %v1892_v8, %v1620_v33  ;;  %v1632_v39 = vmul.f32 %v1896_v34, %v1419_v24  ;;  %vm1637_vm8 = vweird.f32 %v1896_v34 }
 0x238   : > { %v1629_v40 = vsel %vm1626_vm7, %v1628_v35, %v1624_v38  ;;  %1897 = vrcp.f32 %v1420_v37  ;;  %vm1638_vm10 = vmor %vm1636_vm9, %vm1637_vm8  ;;  %v1657_v53 = vand.u32 2147483648, %v1420_v37  ;;  %v1655_v55 = vand.u32 2147483647, %v1420_v37 }
 0x239   : > { %1674 = vst [vmem:[%s2561_s14 + $0x68] sm:$0xff] %v1629_v40  ;;  %v1633_v42 = vsub.f32 1.0, %v1632_v39  ;;  %vm1651_vm13 = vweird.f32 %v1420_v37 }
 0x23a   : > { %v1658_v57 = vor.u32 1.1754944e-38, %v1657_v53  ;;  %vm1656_vm15 = vcmp.eq.f32.partialorder %v1655_v55, 8.507059e+37 }
 0x23b   : > { %v1634_v44 = vmul.f32 %v1896_v34, %v1633_v42 }
 0x23d   : > { %v1635_v47 = vadd.f32 %v1896_v34, %v1634_v44 }
 0x23e   : > { %v1898_v46 = vpop.eup %1897 }
 0x23f   : > { %v1639_v49 = vsel %vm1638_vm10, %v1896_v34, %v1635_v47  ;;  %v1647_v50 = vmul.f32 %v1898_v46, %v1420_v37  ;;  %vm1652_vm12 = vweird.f32 %v1898_v46 }
 0x240   : > { %v1644_v51 = vsel %vm1641_vm11, %v1643_v48, %v1639_v49  ;;  %vm1653_vm14 = vmor %vm1651_vm13, %vm1652_vm12 }
 0x241   : > { %1675 = vst [vmem:[%s2561_s14 + $0x70] sm:$0xff] %v1644_v51  ;;  %v1648_v52 = vsub.f32 1.0, %v1647_v50 }
 0x243   : > { %v1649_v54 = vmul.f32 %v1898_v46, %v1648_v52 }
 0x245   : > { %v1650_v56 = vadd.f32 %v1898_v46, %v1649_v54 }
 0x247   : > { %v1654_v58 = vsel %vm1653_vm14, %v1898_v46, %v1650_v56 }
 0x248   : > { %v1659_v59 = vsel %vm1656_vm15, %v1658_v57, %v1654_v58 }
 0x249   : > { %1676 = vst [vmem:[%s2561_s14 + $0x78] sm:$0xff] %v1659_v59 }
 0x24a PF: > { %s22_s23 = sadd.s32 1, %s1921_s23   ;;  %s2614_s21 = smov %s1917_s22 }
 0x24b   : > { %p19_p5 = scmp.ge.s32.totalorder %s22_s23, 4   ;;  %s2615_s22 = smov %s2617_s24 }
 0x24d   :  { %21 = sbr.rel (!%p19_p5) target bundleno = 2 (0x2), region = 113 }

</bundles_post_ra>
